<compile_context>
chip_gen: v6e
topology: v6e:2x2x1
jax: 0.10.0
libtpu: 0.0.40
codegen_flags: <defaults>
</compile_context>

<pallas_src>
import numpy as np
import jax
import jax.numpy as jnp
from jax.experimental import pallas as pl
from jax.experimental.pallas import tpu as pltpu


# ----------------------------- Pallas kernels ------------------------------

def _upconv_kernel(x_ref, w_ref, b_ref, o_ref):
    # x_ref: (1, Cin, H*W)      bf16, one batch element, channels-major, flat spatial
    # w_ref: (Chalf*4, Cin)     bf16, ConvTranspose2d weight, rows ordered (o, ky, kx)
    # b_ref: (Chalf*4, 1)       f32
    # o_ref: (1, Chalf*4, H*W)  f32  (lane dim = H*W -> lane dense)
    y = jnp.dot(w_ref[...], x_ref[0], preferred_element_type=jnp.float32)
    o_ref[0] = y + b_ref[...]


def _make_fused_conv_block_kernel(offsets, base, p):
    """conv3x3+BN+ReLU -> conv3x3+BN+ReLU on one whole (padded, flattened) image/step.

    offsets: the 9 flat-spatial tap offsets (ky-1)*Wp + (kx-1).
    base:    zero lane-margin (>= Wp+1, 128-aligned) on each side of the image.
    p:       number of padded-image pixels Hp*Wp.
    """

    def kernel(xbuf_ref, mask_ref, w1_ref, t1_ref, w2_ref, t2_ref, o_ref, h1_ref):
        # xbuf_ref: (1, Cin, Pbuf) bf16  margined, zero-padded, flattened cat input
        # mask_ref: (1, P) f32           1.0 on interior pixels, 0.0 on the pad ring
        # w1_ref:   (Cout, 9*Cin) bf16   BN-scale-folded conv1 weights
        # t1_ref:   (Cout, 1) f32        conv1 bias/BN shift
        # w2_ref:   (Cout, 9*Cout) bf16  BN-scale-folded conv2 weights
        # t2_ref:   (Cout, 1) f32
        # o_ref:    (1, Cout, P) f32
        # h1_ref:   (Cout, Pbuf) f32     VMEM scratch for the intermediate activation
        x = xbuf_ref[0].astype(jnp.float32)                       # (Cin, Pbuf)

        # conv1: 9 taps = lane-shifted slices, concatenated -> ONE K=9*Cin matmul.
        taps1 = jnp.concatenate(
            [x[:, base + off: base + off + p] for off in offsets], axis=0)
        a1 = jnp.dot(w1_ref[...], taps1.astype(jnp.bfloat16),
                     preferred_element_type=jnp.float32)          # (Cout, P)
        # BN shift + ReLU; mask zeroes the pad ring so it acts as conv2's zero padding.
        h1 = jnp.maximum(a1 + t1_ref[...], 0.0) * mask_ref[...]

        # h1 stays in VMEM (never round-trips HBM); margins stay zero for conv2 taps.
        h1_ref[...] = jnp.zeros_like(h1_ref)
        h1_ref[:, base:base + p] = h1

        h = h1_ref[...]
        taps2 = jnp.concatenate(
            [h[:, base + off: base + off + p] for off in offsets], axis=0)
        a2 = jnp.dot(w2_ref[...], taps2.astype(jnp.bfloat16),
                     preferred_element_type=jnp.float32)
        o_ref[0] = jnp.maximum(a2 + t2_ref[...], 0.0)

    return kernel


# ------------------------------ wrappers -----------------------------------

def upconv2x2_stride2(x_nchw, w, b):
    """PyTorch ConvTranspose2d(Cin, Cin//2, kernel_size=2, stride=2), NCHW in/out."""
    n, cin, h, wd = x_nchw.shape
    chalf = w.shape[1]
    hw = h * wd
    x2 = x_nchw.reshape(n, cin, hw).astype(jnp.bfloat16)
    # rows ordered (o, ky, kx) so the pixel shuffle below is a plain reshape/transpose
    wmat = jnp.transpose(w, (1, 2, 3, 0)).reshape(chalf * 4, cin).astype(jnp.bfloat16)
    bmat = jnp.repeat(b, 4).reshape(chalf * 4, 1).astype(jnp.float32)
    up_flat = pl.pallas_call(
        _upconv_kernel,
        out_shape=jax.ShapeDtypeStruct((n, chalf * 4, hw), jnp.float32),
        grid=(n,),
        in_specs=[
            pl.BlockSpec((1, cin, hw), lambda i: (i, 0, 0)),
            pl.BlockSpec((chalf * 4, cin), lambda i: (0, 0)),
            pl.BlockSpec((chalf * 4, 1), lambda i: (0, 0)),
        ],
        out_specs=pl.BlockSpec((1, chalf * 4, hw), lambda i: (i, 0, 0)),
        compiler_params=pltpu.CompilerParams(dimension_semantics=("parallel",)),
    )(x2, wmat, bmat)
    # pixel shuffle (pure layout glue): (N, Chalf, 2, 2, H, W) -> (N, Chalf, 2H, 2W)
    up = up_flat.reshape(n, chalf, 2, 2, h, wd).transpose(0, 1, 4, 2, 5, 3)
    return up.reshape(n, chalf, 2 * h, 2 * wd)


def conv_block_fused(cat_nchw, w1m, t1, w2m, t2):
    """Fused conv3x3+BN+ReLU -> conv3x3+BN+ReLU on an NCHW input, NCHW output."""
    n, cin, hh, ww = cat_nchw.shape
    cout = w1m.shape[0]
    hp, wp = hh + 2, ww + 2
    p = hp * wp
    base = ((wp + 1 + 127) // 128) * 128        # lane margin, >= Wp+1, 128-aligned
    pbuf = p + 2 * base

    # zero conv padding (spatial) + zero lane margins, flattened channels-major layout
    catp = jnp.pad(cat_nchw, ((0, 0), (0, 0), (1, 1), (1, 1)))
    xbuf = jnp.pad(catp.reshape(n, cin, p), ((0, 0), (0, 0), (base, base)))
    xbuf = xbuf.astype(jnp.bfloat16)

    # interior mask: 1 on real output pixels, 0 on the pad ring (conv2's zero padding)
    m = np.zeros((hp, wp), np.float32)
    m[1:-1, 1:-1] = 1.0
    mask = jnp.asarray(m.reshape(1, p))

    offsets = tuple((ky - 1) * wp + (kx - 1) for ky in range(3) for kx in range(3))
    kernel = _make_fused_conv_block_kernel(offsets, base, p)

    out_flat = pl.pallas_call(
        kernel,
        out_shape=jax.ShapeDtypeStruct((n, cout, p), jnp.float32),
        grid=(n,),
        in_specs=[
            pl.BlockSpec((1, cin, pbuf), lambda i: (i, 0, 0)),
            pl.BlockSpec((1, p), lambda i: (0, 0)),
            pl.BlockSpec((cout, w1m.shape[1]), lambda i: (0, 0)),
            pl.BlockSpec((cout, 1), lambda i: (0, 0)),
            pl.BlockSpec((cout, w2m.shape[1]), lambda i: (0, 0)),
            pl.BlockSpec((cout, 1), lambda i: (0, 0)),
        ],
        out_specs=pl.BlockSpec((1, cout, p), lambda i: (i, 0, 0)),
        scratch_shapes=[pltpu.VMEM((cout, pbuf), jnp.float32)],
        compiler_params=pltpu.CompilerParams(dimension_semantics=("parallel",)),
    )(xbuf, mask, w1m, t1, w2m, t2)

    # drop the pad ring -> already NCHW
    return out_flat.reshape(n, cout, hp, wp)[:, :, 1:-1, 1:-1]


def decoder_forward(params, x_nchw, skip_nchw):
    """Decoder.forward(x, skip): up(x) -> cat((skip, up), dim=1) -> conv_block."""
    eps = 1e-5
    cout = params["c1_w"].shape[-1]

    up = upconv2x2_stride2(x_nchw, params["up_w"], params["up_b"])
    cat = jnp.concatenate([skip_nchw, up], axis=1)   # torch.cat((skip, x), dim=1)

    # fold eval-mode BatchNorm scale into conv weights, keep only the shift
    def fold(w_hwio, bias, gamma, beta, mean, var):
        scale = gamma / jnp.sqrt(var + eps)                                  # (Cout,)
        wmat = w_hwio.reshape(9, -1, cout).transpose(2, 0, 1).reshape(cout, -1)
        wmat = (wmat * scale[:, None]).astype(jnp.bfloat16)                  # (Cout, 9*Cin)
        shift = (beta + (bias - mean) * scale).reshape(cout, 1).astype(jnp.float32)
        return wmat, shift

    w1m, t1 = fold(params["c1_w"], params["c1_b"], params["c1_gamma"],
                   params["c1_beta"], params["c1_mean"], params["c1_var"])
    w2m, t2 = fold(params["c2_w"], params["c2_b"], params["c2_gamma"],
                   params["c2_beta"], params["c2_mean"], params["c2_var"])

    return conv_block_fused(cat, w1m, t1, w2m, t2)


# ------------------------- params & pure-JAX reference ----------------------

def init_params(key, in_channels, out_channels):
    chalf = in_channels // 2
    ks = jax.random.split(key, 14)
    p = {}
    p["up_w"] = 0.1 * jax.random.normal(ks[0], (in_channels, chalf, 2, 2), jnp.float32)
    p["up_b"] = 0.1 * jax.random.normal(ks[1], (chalf,), jnp.float32)

    p["c1_w"] = 0.1 * jax.random.normal(ks[2], (3, 3, in_channels, out_channels), jnp.float32)
    p["c1_b"] = 0.1 * jax.random.normal(ks[3], (out_channels,), jnp.float32)
    p["c1_gamma"] = 1.0 + 0.1 * jax.random.normal(ks[4], (out_channels,), jnp.float32)
    p["c1_beta"] = 0.1 * jax.random.normal(ks[5], (out_channels,), jnp.float32)
    p["c1_mean"] = 0.1 * jax.random.normal(ks[6], (out_channels,), jnp.float32)
    p["c1_var"] = jax.random.uniform(ks[7], (out_channels,), jnp.float32, 0.5, 1.5)

    p["c2_w"] = 0.1 * jax.random.normal(ks[8], (3, 3, out_channels, out_channels), jnp.float32)
    p["c2_b"] = 0.1 * jax.random.normal(ks[9], (out_channels,), jnp.float32)
    p["c2_gamma"] = 1.0 + 0.1 * jax.random.normal(ks[10], (out_channels,), jnp.float32)
    p["c2_beta"] = 0.1 * jax.random.normal(ks[11], (out_channels,), jnp.float32)
    p["c2_mean"] = 0.1 * jax.random.normal(ks[12], (out_channels,), jnp.float32)
    p["c2_var"] = jax.random.uniform(ks[13], (out_channels,), jnp.float32, 0.5, 1.5)
    return p


def reference_forward(params, x_nchw, skip_nchw, eps=1e-5):
    x = jnp.transpose(x_nchw, (0, 2, 3, 1))
    skip = jnp.transpose(skip_nchw, (0, 2, 3, 1))
    n, h, w = x.shape[:3]
    chalf = params["up_w"].shape[1]
    up = jnp.einsum("nhwi,iopq->nhwopq", x, params["up_w"])
    up = up + params["up_b"][None, None, None, :, None, None]
    up = up.transpose(0, 1, 4, 2, 5, 3).reshape(n, 2 * h, 2 * w, chalf)
    cat = jnp.concatenate([skip, up], axis=-1)

    def block(xin, wk, bias, gamma, beta, mean, var):
        y = jax.lax.conv_general_dilated(
            xin, wk, (1, 1), "SAME",
            dimension_numbers=("NHWC", "HWIO", "NHWC")) + bias
        y = (y - mean) / jnp.sqrt(var + eps) * gamma + beta
        return jnp.maximum(y, 0.0)

    h1 = block(cat, params["c1_w"], params["c1_b"], params["c1_gamma"],
               params["c1_beta"], params["c1_mean"], params["c1_var"])
    h2 = block(h1, params["c2_w"], params["c2_b"], params["c2_gamma"],
               params["c2_beta"], params["c2_mean"], params["c2_var"])
    return jnp.transpose(h2, (0, 3, 1, 2))


# ----------------------------------- main -----------------------------------

if __name__ == "__main__":
    in_channels, out_channels = 8, 8
    N, H, W = 2, 16, 16

    key = jax.random.PRNGKey(0)
    kx, ksk, kp = jax.random.split(key, 3)
    x = jax.random.normal(kx, (N, in_channels, H, W), jnp.float32)            # NCHW like PyTorch
    skip = jax.random.normal(ksk, (N, in_channels // 2, 2 * H, 2 * W), jnp.float32)
    params = init_params(kp, in_channels, out_channels)

    out = jax.jit(decoder_forward)(params, x, skip)
    out = jax.block_until_ready(out)

    ref = reference_forward(params, x, skip)
    np.testing.assert_allclose(np.asarray(out), np.asarray(ref), rtol=2e-2, atol=2e-2)
    assert out.shape == (N, out_channels, 2 * H, 2 * W)
    print("KERNEL_OK")
</pallas_src>

<mosaic_0001>
module attributes {stable_mosaic.version = 11 : i64} {
  func.func @_upconv_kernel(%arg0: i32, %arg1: memref<1x8x256xbf16, #tpu.memory_space<vmem>>, %arg2: memref<16x8xbf16, #tpu.memory_space<vmem>>, %arg3: memref<16x1xf32, #tpu.memory_space<vmem>>, %arg4: memref<1x16x256xf32, #tpu.memory_space<vmem>>) attributes {dimension_semantics = [#tpu.dimension_semantics<parallel>], iteration_bounds = array<i64: 2>, scalar_prefetch = 0 : i64, scratch_operands = 0 : i64, tpu.core_type = #tpu.core_type<tc>, window_params = [{transform_indices = @transform_0, window_bounds = array<i64: 1, 8, 256>}, {pipeline_mode = #tpu.pipeline_mode<synchronous>, transform_indices = @transform_1, window_bounds = array<i64: 16, 8>}, {pipeline_mode = #tpu.pipeline_mode<synchronous>, transform_indices = @transform_2, window_bounds = array<i64: 16, 1>}, {transform_indices = @transform_3, window_bounds = array<i64: 1, 16, 256>}]} {
    %c0 = arith.constant 0 : index
    %c0_0 = arith.constant 0 : index
    %0 = vector.load %arg2[%c0, %c0_0] : memref<16x8xbf16, #tpu.memory_space<vmem>>, vector<16x8xbf16>
    %c0_1 = arith.constant 0 : index
    %c0_2 = arith.constant 0 : index
    %c0_3 = arith.constant 0 : index
    %1 = vector.load %arg1[%c0_1, %c0_2, %c0_3] : memref<1x8x256xbf16, #tpu.memory_space<vmem>>, vector<1x8x256xbf16>
    %2 = vector.shape_cast %1 : vector<1x8x256xbf16> to vector<8x256xbf16>
    %cst = arith.constant dense<0.000000e+00> : vector<16x256xf32>
    %3 = tpu.matmul %0, %2, %cst {dimension_numbers = #tpu.dot_dimension_numbers<[1], [0], [0], [1], [0, 0, 1, 1], [], []>} : vector<16x8xbf16>, vector<8x256xbf16>, vector<16x256xf32> -> vector<16x256xf32>
    %c0_4 = arith.constant 0 : index
    %c0_5 = arith.constant 0 : index
    %4 = vector.load %arg3[%c0_4, %c0_5] : memref<16x1xf32, #tpu.memory_space<vmem>>, vector<16x1xf32>
    %5 = vector.broadcast %4 : vector<16x1xf32> to vector<16x256xf32>
    %6 = arith.addf %3, %5 : vector<16x256xf32>
    %c0_6 = arith.constant 0 : index
    %c0_7 = arith.constant 0 : index
    %c0_8 = arith.constant 0 : index
    %7 = vector.load %arg4[%c0_6, %c0_7, %c0_8] : memref<1x16x256xf32, #tpu.memory_space<vmem>>, vector<1x16x256xf32>
    %8 = vector.shape_cast %7 : vector<1x16x256xf32> to vector<16x256xf32>
    %9 = vector.shape_cast %6 : vector<16x256xf32> to vector<1x16x256xf32>
    tpu.vector_store %arg4[%c0_6, %c0_7, %c0_8], %9 {strides = array<i32>} : memref<1x16x256xf32, #tpu.memory_space<vmem>>, vector<1x16x256xf32>,
    return
  }
  func.func @transform_0(%arg0: i32) -> (i32, i32, i32) {
    %c0_i32 = arith.constant 0 : i32
    %c0_i32_0 = arith.constant 0 : i32
    %c0_i32_1 = arith.constant 0 : i32
    return %arg0, %c0_i32, %c0_i32_0 : i32, i32, i32
  }
  func.func @transform_1(%arg0: i32) -> (i32, i32) {
    %c0_i32 = arith.constant 0 : i32
    %c0_i32_0 = arith.constant 0 : i32
    %c0_i32_1 = arith.constant 0 : i32
    return %c0_i32, %c0_i32_0 : i32, i32
  }
  func.func @transform_2(%arg0: i32) -> (i32, i32) {
    %c0_i32 = arith.constant 0 : i32
    %c0_i32_0 = arith.constant 0 : i32
    %c0_i32_1 = arith.constant 0 : i32
    return %c0_i32, %c0_i32_0 : i32, i32
  }
  func.func @transform_3(%arg0: i32) -> (i32, i32, i32) {
    %c0_i32 = arith.constant 0 : i32
    %c0_i32_0 = arith.constant 0 : i32
    %c0_i32_1 = arith.constant 0 : i32
    return %arg0, %c0_i32, %c0_i32_0 : i32, i32, i32
  }
}

module attributes {stable_mosaic.version = 11 : i64} {
  func.func @kernel(%arg0: i32, %arg1: memref<1x8x1412xbf16, #tpu.memory_space<vmem>>, %arg2: memref<1x1156xf32, #tpu.memory_space<vmem>>, %arg3: memref<8x72xbf16, #tpu.memory_space<vmem>>, %arg4: memref<8x1xf32, #tpu.memory_space<vmem>>, %arg5: memref<8x72xbf16, #tpu.memory_space<vmem>>, %arg6: memref<8x1xf32, #tpu.memory_space<vmem>>, %arg7: memref<1x8x1156xf32, #tpu.memory_space<vmem>>, %arg8: memref<8x1412xf32, #tpu.memory_space<vmem>>) attributes {dimension_semantics = [#tpu.dimension_semantics<parallel>], iteration_bounds = array<i64: 2>, scalar_prefetch = 0 : i64, scratch_operands = 1 : i64, tpu.core_type = #tpu.core_type<tc>, window_params = [{transform_indices = @transform_0, window_bounds = array<i64: 1, 8, 1412>}, {pipeline_mode = #tpu.pipeline_mode<synchronous>, transform_indices = @transform_1, window_bounds = array<i64: 1, 1156>}, {pipeline_mode = #tpu.pipeline_mode<synchronous>, transform_indices = @transform_2, window_bounds = array<i64: 8, 72>}, {pipeline_mode = #tpu.pipeline_mode<synchronous>, transform_indices = @transform_3, window_bounds = array<i64: 8, 1>}, {pipeline_mode = #tpu.pipeline_mode<synchronous>, transform_indices = @transform_4, window_bounds = array<i64: 8, 72>}, {pipeline_mode = #tpu.pipeline_mode<synchronous>, transform_indices = @transform_5, window_bounds = array<i64: 8, 1>}, {transform_indices = @transform_6, window_bounds = array<i64: 1, 8, 1156>}]} {
    %c0 = arith.constant 0 : index
    %c0_0 = arith.constant 0 : index
    %c0_1 = arith.constant 0 : index
    %0 = vector.load %arg1[%c0, %c0_0, %c0_1] : memref<1x8x1412xbf16, #tpu.memory_space<vmem>>, vector<1x8x1412xbf16>
    %1 = vector.shape_cast %0 : vector<1x8x1412xbf16> to vector<8x1412xbf16>
    %2 = arith.extf %1 : vector<8x1412xbf16> to vector<8x1412xf32>
    %3 = vector.extract_strided_slice %2 {offsets = [0, 93], sizes = [8, 1156], strides = [1, 1]} : vector<8x1412xf32> to vector<8x1156xf32>
    %4 = vector.extract_strided_slice %2 {offsets = [0, 94], sizes = [8, 1156], strides = [1, 1]} : vector<8x1412xf32> to vector<8x1156xf32>
    %5 = vector.extract_strided_slice %2 {offsets = [0, 95], sizes = [8, 1156], strides = [1, 1]} : vector<8x1412xf32> to vector<8x1156xf32>
    %6 = vector.extract_strided_slice %2 {offsets = [0, 127], sizes = [8, 1156], strides = [1, 1]} : vector<8x1412xf32> to vector<8x1156xf32>
    %7 = vector.extract_strided_slice %2 {offsets = [0, 128], sizes = [8, 1156], strides = [1, 1]} : vector<8x1412xf32> to vector<8x1156xf32>
    %8 = vector.extract_strided_slice %2 {offsets = [0, 129], sizes = [8, 1156], strides = [1, 1]} : vector<8x1412xf32> to vector<8x1156xf32>
    %9 = vector.extract_strided_slice %2 {offsets = [0, 161], sizes = [8, 1156], strides = [1, 1]} : vector<8x1412xf32> to vector<8x1156xf32>
    %10 = vector.extract_strided_slice %2 {offsets = [0, 162], sizes = [8, 1156], strides = [1, 1]} : vector<8x1412xf32> to vector<8x1156xf32>
    %11 = vector.extract_strided_slice %2 {offsets = [0, 163], sizes = [8, 1156], strides = [1, 1]} : vector<8x1412xf32> to vector<8x1156xf32>
    %12 = tpu.concatenate %3, %4, %5, %6, %7, %8, %9, %10, %11 in 0 : vector<8x1156xf32>, vector<8x1156xf32>, vector<8x1156xf32>, vector<8x1156xf32>, vector<8x1156xf32>, vector<8x1156xf32>, vector<8x1156xf32>, vector<8x1156xf32>, vector<8x1156xf32> -> vector<72x1156xf32>
    %c0_2 = arith.constant 0 : index
    %c0_3 = arith.constant 0 : index
    %13 = vector.load %arg3[%c0_2, %c0_3] : memref<8x72xbf16, #tpu.memory_space<vmem>>, vector<8x72xbf16>
    %14 = arith.truncf %12 : vector<72x1156xf32> to vector<72x1156xbf16>
    %cst = arith.constant dense<0.000000e+00> : vector<8x1156xf32>
    %15 = tpu.matmul %13, %14, %cst {dimension_numbers = #tpu.dot_dimension_numbers<[1], [0], [0], [1], [0, 0, 1, 1], [], []>} : vector<8x72xbf16>, vector<72x1156xbf16>, vector<8x1156xf32> -> vector<8x1156xf32>
    %c0_4 = arith.constant 0 : index
    %c0_5 = arith.constant 0 : index
    %16 = vector.load %arg4[%c0_4, %c0_5] : memref<8x1xf32, #tpu.memory_space<vmem>>, vector<8x1xf32>
    %17 = vector.broadcast %16 : vector<8x1xf32> to vector<8x1156xf32>
    %18 = arith.addf %15, %17 : vector<8x1156xf32>
    %cst_6 = arith.constant 0.000000e+00 : f32
    %19 = vector.broadcast %cst_6 : f32 to vector<8x1156xf32>
    %20 = arith.maximumf %18, %19 : vector<8x1156xf32>
    %c0_7 = arith.constant 0 : index
    %c0_8 = arith.constant 0 : index
    %21 = vector.load %arg2[%c0_7, %c0_8] : memref<1x1156xf32, #tpu.memory_space<vmem>>, vector<1x1156xf32>
    %22 = vector.broadcast %21 : vector<1x1156xf32> to vector<8x1156xf32>
    %23 = arith.mulf %20, %22 : vector<8x1156xf32>
    %cst_9 = arith.constant 0.000000e+00 : f32
    %24 = vector.broadcast %cst_9 : f32 to vector<8x1412xf32>
    %c0_10 = arith.constant 0 : index
    %c0_11 = arith.constant 0 : index
    %25 = vector.load %arg8[%c0_10, %c0_11] : memref<8x1412xf32, #tpu.memory_space<vmem>>, vector<8x1412xf32>
    tpu.vector_store %arg8[%c0_10, %c0_11], %24 {strides = array<i32>} : memref<8x1412xf32, #tpu.memory_space<vmem>>, vector<8x1412xf32>,
    %c0_12 = arith.constant 0 : index
    %c128 = arith.constant 128 : index
    %26 = vector.load %arg8[%c0_12, %c128] : memref<8x1412xf32, #tpu.memory_space<vmem>>, vector<8x1156xf32>
    tpu.vector_store %arg8[%c0_12, %c128], %23 {strides = array<i32>} : memref<8x1412xf32, #tpu.memory_space<vmem>>, vector<8x1156xf32>,
    %c0_13 = arith.constant 0 : index
    %c0_14 = arith.constant 0 : index
    %27 = vector.load %arg8[%c0_13, %c0_14] : memref<8x1412xf32, #tpu.memory_space<vmem>>, vector<8x1412xf32>
    %28 = vector.extract_strided_slice %27 {offsets = [0, 93], sizes = [8, 1156], strides = [1, 1]} : vector<8x1412xf32> to vector<8x1156xf32>
    %29 = vector.extract_strided_slice %27 {offsets = [0, 94], sizes = [8, 1156], strides = [1, 1]} : vector<8x1412xf32> to vector<8x1156xf32>
    %30 = vector.extract_strided_slice %27 {offsets = [0, 95], sizes = [8, 1156], strides = [1, 1]} : vector<8x1412xf32> to vector<8x1156xf32>
    %31 = vector.extract_strided_slice %27 {offsets = [0, 127], sizes = [8, 1156], strides = [1, 1]} : vector<8x1412xf32> to vector<8x1156xf32>
    %32 = vector.extract_strided_slice %27 {offsets = [0, 128], sizes = [8, 1156], strides = [1, 1]} : vector<8x1412xf32> to vector<8x1156xf32>
    %33 = vector.extract_strided_slice %27 {offsets = [0, 129], sizes = [8, 1156], strides = [1, 1]} : vector<8x1412xf32> to vector<8x1156xf32>
    %34 = vector.extract_strided_slice %27 {offsets = [0, 161], sizes = [8, 1156], strides = [1, 1]} : vector<8x1412xf32> to vector<8x1156xf32>
    %35 = vector.extract_strided_slice %27 {offsets = [0, 162], sizes = [8, 1156], strides = [1, 1]} : vector<8x1412xf32> to vector<8x1156xf32>
    %36 = vector.extract_strided_slice %27 {offsets = [0, 163], sizes = [8, 1156], strides = [1, 1]} : vector<8x1412xf32> to vector<8x1156xf32>
    %37 = tpu.concatenate %28, %29, %30, %31, %32, %33, %34, %35, %36 in 0 : vector<8x1156xf32>, vector<8x1156xf32>, vector<8x1156xf32>, vector<8x1156xf32>, vector<8x1156xf32>, vector<8x1156xf32>, vector<8x1156xf32>, vector<8x1156xf32>, vector<8x1156xf32> -> vector<72x1156xf32>
    %c0_15 = arith.constant 0 : index
    %c0_16 = arith.constant 0 : index
    %38 = vector.load %arg5[%c0_15, %c0_16] : memref<8x72xbf16, #tpu.memory_space<vmem>>, vector<8x72xbf16>
    %39 = arith.truncf %37 : vector<72x1156xf32> to vector<72x1156xbf16>
    %cst_17 = arith.constant dense<0.000000e+00> : vector<8x1156xf32>
    %40 = tpu.matmul %38, %39, %cst_17 {dimension_numbers = #tpu.dot_dimension_numbers<[1], [0], [0], [1], [0, 0, 1, 1], [], []>} : vector<8x72xbf16>, vector<72x1156xbf16>, vector<8x1156xf32> -> vector<8x1156xf32>
    %c0_18 = arith.constant 0 : index
    %c0_19 = arith.constant 0 : index
    %41 = vector.load %arg6[%c0_18, %c0_19] : memref<8x1xf32, #tpu.memory_space<vmem>>, vector<8x1xf32>
    %42 = vector.broadcast %41 : vector<8x1xf32> to vector<8x1156xf32>
    %43 = arith.addf %40, %42 : vector<8x1156xf32>
    %cst_20 = arith.constant 0.000000e+00 : f32
    %44 = vector.broadcast %cst_20 : f32 to vector<8x1156xf32>
    %45 = arith.maximumf %43, %44 : vector<8x1156xf32>
    %c0_21 = arith.constant 0 : index
    %c0_22 = arith.constant 0 : index
    %c0_23 = arith.constant 0 : index
    %46 = vector.load %arg7[%c0_21, %c0_22, %c0_23] : memref<1x8x1156xf32, #tpu.memory_space<vmem>>, vector<1x8x1156xf32>
    %47 = vector.shape_cast %46 : vector<1x8x1156xf32> to vector<8x1156xf32>
    %48 = vector.shape_cast %45 : vector<8x1156xf32> to vector<1x8x1156xf32>
    tpu.vector_store %arg7[%c0_21, %c0_22, %c0_23], %48 {strides = array<i32>} : memref<1x8x1156xf32, #tpu.memory_space<vmem>>, vector<1x8x1156xf32>,
    return
  }
  func.func @transform_0(%arg0: i32) -> (i32, i32, i32) {
    %c0_i32 = arith.constant 0 : i32
    %c0_i32_0 = arith.constant 0 : i32
    %c0_i32_1 = arith.constant 0 : i32
    return %arg0, %c0_i32, %c0_i32_0 : i32, i32, i32
  }
  func.func @transform_1(%arg0: i32) -> (i32, i32) {
    %c0_i32 = arith.constant 0 : i32
    %c0_i32_0 = arith.constant 0 : i32
    %c0_i32_1 = arith.constant 0 : i32
    return %c0_i32, %c0_i32_0 : i32, i32
  }
  func.func @transform_2(%arg0: i32) -> (i32, i32) {
    %c0_i32 = arith.constant 0 : i32
    %c0_i32_0 = arith.constant 0 : i32
    %c0_i32_1 = arith.constant 0 : i32
    return %c0_i32, %c0_i32_0 : i32, i32
  }
  func.func @transform_3(%arg0: i32) -> (i32, i32) {
    %c0_i32 = arith.constant 0 : i32
    %c0_i32_0 = arith.constant 0 : i32
    %c0_i32_1 = arith.constant 0 : i32
    return %c0_i32, %c0_i32_0 : i32, i32
  }
  func.func @transform_4(%arg0: i32) -> (i32, i32) {
    %c0_i32 = arith.constant 0 : i32
    %c0_i32_0 = arith.constant 0 : i32
    %c0_i32_1 = arith.constant 0 : i32
    return %c0_i32, %c0_i32_0 : i32, i32
  }
  func.func @transform_5(%arg0: i32) -> (i32, i32) {
    %c0_i32 = arith.constant 0 : i32
    %c0_i32_0 = arith.constant 0 : i32
    %c0_i32_1 = arith.constant 0 : i32
    return %c0_i32, %c0_i32_0 : i32, i32
  }
  func.func @transform_6(%arg0: i32) -> (i32, i32, i32) {
    %c0_i32 = arith.constant 0 : i32
    %c0_i32_0 = arith.constant 0 : i32
    %c0_i32_1 = arith.constant 0 : i32
    return %arg0, %c0_i32, %c0_i32_0 : i32, i32, i32
  }
}

</mosaic_0001>

<bundles_post_ra>
// kernel: decoder_forward.2
= control target key start
LH: loop header
LB: loop body
LE: loop exit
PB: predicated region body
PF: predicated region fallthrough
CT: control target
= control target key end

     0   :  { %s370_s12 = smov 0   ;;  %s396_s0 = inlined_call_operand.vmem [shape: bf16[2,8,256], index: 0, kind: input, shape index: {}]   ;;  %s397_s1 = inlined_call_operand.vmem [shape: bf16[16,8], index: 1, kind: input, shape index: {}]   ;;  %s398_s2 = inlined_call_operand.vmem [shape: f32[16,1], index: 2, kind: input, shape index: {}]   ;;  %s399_s3 = inlined_call_operand.vmem [shape: f32[2,16,256], index: 3, kind: output, shape index: {}]  }
   0x1 LB: > { %s310_s13 = sadd.s32 4294967295, %s347_s12   ;;  %p314_p0 = scmp.ge.s32.totalorder %s347_s12, 1  ;;  %s347_s12 = sphi %s370_s12, %s13_s12  }
   0x2   : > { %p137_p1 = scmp.lt.s32.totalorder %s347_s12, 3 }
   0x4   : > { %p138_p2 = pnand %p314_p0, %p137_p1 }
   0x5   : > { %p161_p3 = scmp.lt.s32.totalorder (!%p138_p2), %s310_s13, 1 }
   0x6   : > { %141 = sbr.rel (%p138_p2) target bundleno = 223 (0xdf), region = 32 }
   0xb   : > { %v349_v0 = vmov 0   ;;  %v175_v1 = vld [vmem:[%s398_s2] sm:$0xff]  ;;  %s401_s13 = smov (!%p161_p3, %s310_s13), 1  ;;  %v176_v2 = vld [vmem:[%s398_s2 + $0x8] sm:$0xff]  ;;  %vm201_vm0 = vcmask 1043456   ;;  %vm197_vm1 = vcmask 64512  }
   0xc   : > { %240 = vmatprep.mubr.bf16.mxu0 %v349_v0  ;;  %337 = vset.pattern.permute.xlu0 %v349_v0  ;;  %s326_s18 = sshll.u32 %s401_s13, 3  ;;  %v340_v7 = vld [vmem:[%s397_s1] sm:$0xff]   ;;  %s327_s24 = sshll.u32 %s401_s13, 5 }
   0xd   : > { %179 = vperm.xlu0 %337, %v175_v1   ;;  %s165_s21 = scalar_lea.vmem %s396_s0, %s326_s18  ;;  %s170_s27 = scalar_lea.vmem %s399_s3, %s327_s24 }
   0xe   : > { %v174_v3 = vld [vmem:[%s165_s21] sm:$0xff] }
   0xf   : > { %v321_v4 = vcombine.high %v174_v3, %v174_v3  ;;  %v320_v5 = vcombine.low %v174_v3, %v174_v3 }
  0x11   : > { %184 = vperm.xlu0 %337, %v176_v2   ;;  %322 = vmatprep.subr.msk.bf16.mxu0 %vm201_vm0, %v321_v4  ;;  %v203_v6 = vsel %vm201_vm0, %v320_v5, 0 }
  0x12   : > { %223 = vmatpush1.bf16.msra.mxu0 %v203_v6 }
  0x15   : > { %323 = vmatmul.mubr.msk.bf16.vlgmr.msra.gmra.mxu0 %vm197_vm1, %v340_v7 }
  0x88   : > { %v180_v8 = vpop.permute.xlu0 %179 }
  0x8c   : > { %v185_v13 = vpop.permute.xlu0 %184 }
  0xd5   : > { %v242_v9 = vpop.f32.mrf.mxu0 }
  0xd6   : > { %v243_v10 = vadd.f32 %v242_v9, %v180_v8 }
  0xd7   : > { %v244_v11 = vpop.f32.mrf.mxu0 }
  0xd8   : > { %251 = vst [vmem:[%s170_s27] sm:$0xff] %v243_v10  ;;  %v245_v12 = vadd.f32 %v244_v11, %v180_v8 }
  0xd9   : > { %v246_v14 = vpop.f32.mrf.mxu0 }
  0xda   : > { %252 = vst [vmem:[%s170_s27 + $0x8] sm:$0xff] %v245_v12  ;;  %v247_v15 = vadd.f32 %v246_v14, %v185_v13 }
  0xdb   : > { %v248_v16 = vpop.f32.mrf.mxu0 }
  0xdc   : > { %253 = vst [vmem:[%s170_s27 + $0x10] sm:$0xff] %v247_v15  ;;  %v249_v17 = vadd.f32 %v248_v16, %v185_v13 }
  0xde   : > { %254 = vst [vmem:[%s170_s27 + $0x18] sm:$0xff] %v249_v17 }
  0xdf PF: > { %s13_s12 = sadd.s32 1, %s347_s12  }
  0xe0   : > { %p10_p4 = scmp.ge.s32.totalorder %s13_s12, 4  }
  0xe2   :  { %12 = sbr.rel (!%p10_p4) target bundleno = 1 (0x1), region = 62 }

// kernel: decoder_forward.3
= control target key start
LH: loop header
LB: loop body
LE: loop exit
PB: predicated region body
PF: predicated region fallthrough
CT: control target
= control target key end

     0   :  { %s2682_s21 = smov 0   ;;  %s3714_s0 = inlined_call_operand.vmem [shape: bf16[2,8,1412], index: 0, kind: input, shape index: {}]   ;;  %s3715_s1 = inlined_call_operand.vmem [shape: f32[1,1156], index: 1, kind: input, shape index: {}]   ;;  %s3716_s2 = inlined_call_operand.vmem [shape: bf16[8,72], index: 2, kind: input, shape index: {}]   ;;  %s3717_s3 = inlined_call_operand.vmem [shape: f32[8,1], index: 3, kind: input, shape index: {}]   ;;  %s3718_s4 = inlined_call_operand.vmem [shape: bf16[8,72], index: 4, kind: input, shape index: {}]   ;;  %s3719_s5 = inlined_call_operand.vmem [shape: f32[8,1], index: 5, kind: input, shape index: {}]   ;;  %s3720_s6 = inlined_call_operand.vmem [shape: f32[2,8,1156], index: 6, kind: output, shape index: {}]  }
   0x1 LB: > { %s2176_s22 = sadd.s32 4294967295, %s2634_s21   ;;  %p2180_p0 = scmp.ge.s32.totalorder %s2634_s21, 1  ;;  %s2634_s21 = sphi %s2682_s21, %s16_s21  }
   0x2   : > { %p212_p1 = scmp.lt.s32.totalorder %s2634_s21, 3 }
   0x4   : > { %p213_p2 = pnand %p2180_p0, %p212_p1 }
   0x5   : > { %p242_p3 = scmp.lt.s32.totalorder (!%p213_p2), %s2176_s22, 1  ;;  %s2636_s27 = smov (!%p213_p2), 58  }
   0x6   : > { %216 = sbr.rel (%p213_p2) target bundleno = 1084 (0x43c), region = 44  ;;  %s2637_s28 = smov (!%p213_p2), 60  }
   0x7   : > { %s2638_s29 = smov (!%p213_p2), 59   ;;  %s2639_s30 = smov (!%p213_p2), 93  }
   0x8   : > { %s2640_s7 = smov (!%p213_p2), 92   ;;  %s2641_s8 = smov (!%p213_p2), 126  }
   0x9   : > { %s2642_s9 = smov (!%p213_p2), 94   ;;  %s2643_s10 = smov (!%p213_p2), 127  }
   0xa   : > { %s2644_s11 = smov (!%p213_p2), 35  }
   0xb   : > { %s3722_s22 = smov (!%p242_p3, %s2176_s22), 1  ;;  %vm584_vm0 = vcmask 474112   ;;  %vm544_vm1 = vcmask 482304   ;;  %vm504_vm2 = vcmask 490496   ;;  %vm464_vm3 = vcmask 752640  }
   0xc   : > { %s2205_s23 = smul.u32 48, %s3722_s22  ;;  %vm424_vm4 = vcmask 760832   ;;  %vm340_vm5 = vcmask 1031168   ;;  %vm383_vm6 = vcmask 769024   ;;  %vm300_vm7 = vcmask 1039360  }
   0xd   : > { %vm811_vm8 = vcmask 285696   ;;  %vm901_vm9 = vcmask 1043456   ;;  %vm897_vm10 = vcmask 588800   ;;  %vm1222_vm11 = vcmask 31744  }
   0xe   : > { %s2696_s26 = scalar_lea.vmem %s3714_s0, %s2205_s23 }
   0xf   : > { %v255_v0 = vld [vmem:[%s2696_s26 + $0x10] sm:$0xff]  ;;  %v256_v1 = vld [vmem:[%s2696_s26 + $0x18] sm:$0xff]  ;;  %v2701_v2 = vld [vmem:[%s2696_s26] sm:$0xff] }
  0x10   : > { %v2703_v3 = vunpack.c.h.bf16 %v255_v0  ;;  %v2705_v4 = vunpack.c.l.bf16 %v256_v1  ;;  %v2708_v5 = vld [vmem:[%s2696_s26 + $0x8] sm:$0xff]  ;;  %v2710_v6 = vunpack.c.l.bf16 %v255_v0  ;;  %v260_v7 = vunpack.c.h.bf16 %v2701_v2  ;;  %v257_v16 = vld [vmem:[%s2696_s26 + $0x20] sm:$0xff] }
  0x11   : > { %v261_v8 = vunpack.c.l.bf16 %v2708_v5  ;;  %v2715_v9 = vunpack.c.h.bf16 %v2708_v5  ;;  %v259_v13 = vunpack.c.l.bf16 %v2701_v2  ;;  %v258_v17 = vld [vmem:[%s2696_s26 + $0x28] sm:$0xf]  ;;  %v2754_v18 = vunpack.c.h.bf16 %v257_v16  ;;  %s2206_s26 = smul.u32 80, %s3722_s22 }
  0x12   : > { %v2236_v10 = vpack.i.bf16 %v2705_v4, %v2703_v3  ;;  %v2321_v15 = vpack.i.bf16 %v2703_v3, %v2710_v6  ;;  %v269_v19 = vunpack.c.l.bf16 %v258_v17  ;;  %v2756_v20 = vunpack.c.h.bf16 %v256_v1 }
  0x13   : > { %v2226_v11 = vpack.i.bf16 %v261_v8, %v260_v7  ;;  %v2231_v12 = vpack.i.bf16 %v2710_v6, %v2715_v9  ;;  %v2306_v14 = vpack.i.bf16 %v259_v13, %v2715_v9  ;;  %v2759_v21 = vunpack.c.l.bf16 %v257_v16 }
  0x14   : > { %2237 = vrot.lane.b32.xlu1 %v2236_v10, %s2636_s27  ;;  %v2351_v22 = vpack.i.bf16 %v269_v19, %v2754_v18  ;;  %v2401_v24 = vpack.i.bf16 %v2756_v20, %v2705_v4 }
  0x15   : > { %2227 = vrot.lane.b32.xlu0 %v2226_v11, %s2636_s27  ;;  %v2346_v23 = vpack.i.bf16 %v2759_v21, %v2756_v20  ;;  %v2411_v25 = vpack.i.bf16 %v2754_v18, %v2759_v21 }
  0x18   : > { %2242 = vrot.lane.b32.xlu1 %v2226_v11, %s2637_s28 }
  0x19   : > { %2232 = vrot.lane.b32.xlu0 %v2231_v12, %s2636_s27 }
  0x1c   : > { %2252 = vrot.lane.b32.xlu1 %v2226_v11, %s2638_s29 }
  0x1d   : > { %2247 = vrot.lane.b32.xlu0 %v2231_v12, %s2637_s28 }
  0x20   : > { %2262 = vrot.lane.b32.xlu1 %v2236_v10, %s2637_s28 }
  0x21   : > { %2257 = vrot.lane.b32.xlu0 %v2231_v12, %s2638_s29 }
  0x24   : > { %2272 = vrot.lane.b32.xlu1 %v2226_v11, %s2639_s30 }
  0x25   : > { %2267 = vrot.lane.b32.xlu0 %v2236_v10, %s2638_s29 }
  0x28   : > { %2282 = vrot.lane.b32.xlu1 %v2226_v11, %s2640_s7 }
  0x29   : > { %2277 = vrot.lane.b32.xlu0 %v2231_v12, %s2639_s30 }
  0x2c   : > { %2292 = vrot.lane.b32.xlu1 %v2236_v10, %s2639_s30 }
  0x2d   : > { %2287 = vrot.lane.b32.xlu0 %v2231_v12, %s2640_s7 }
  0x30   : > { %2302 = vrot.lane.b32.xlu1 %v2226_v11, %s2641_s8 }
  0x31   : > { %2297 = vrot.lane.b32.xlu0 %v2236_v10, %s2640_s7 }
  0x34   : > { %2312 = vrot.lane.b32.xlu1 %v2226_v11, %s2642_s9 }
  0x35   : > { %2307 = vrot.lane.b32.xlu0 %v2306_v14, %s2641_s8 }
  0x38   : > { %2322 = vrot.lane.b32.xlu1 %v2321_v15, %s2641_s8 }
  0x39   : > { %2317 = vrot.lane.b32.xlu0 %v2306_v14, %s2642_s9 }
  0x3c   : > { %2332 = vrot.lane.b32.xlu1 %v2226_v11, %s2643_s10 }
  0x3d   : > { %2327 = vrot.lane.b32.xlu0 %v2321_v15, %s2642_s9 }
  0x40   : > { %2342 = vrot.lane.b32.xlu1 %v2321_v15, %s2643_s10 }
  0x41   : > { %2337 = vrot.lane.b32.xlu0 %v2306_v14, %s2643_s10 }
  0x44   : > { %2352 = vrot.lane.b32.xlu1 %v2351_v22, %s2636_s27 }
  0x45   : > { %2347 = vrot.lane.b32.xlu0 %v2346_v23, %s2636_s27 }
  0x48   : > { %2362 = vrot.lane.b32.xlu1 %v2346_v23, %s2638_s29 }
  0x49   : > { %2357 = vrot.lane.b32.xlu0 %v2346_v23, %s2637_s28 }
  0x4c   : > { %2372 = vrot.lane.b32.xlu1 %v2351_v22, %s2638_s29 }
  0x4d   : > { %2367 = vrot.lane.b32.xlu0 %v2351_v22, %s2637_s28 }
  0x50   : > { %2382 = vrot.lane.b32.xlu1 %v2346_v23, %s2640_s7 }
  0x51   : > { %2377 = vrot.lane.b32.xlu0 %v2346_v23, %s2639_s30 }
  0x54   : > { %2392 = vrot.lane.b32.xlu1 %v2351_v22, %s2640_s7 }
  0x55   : > { %2387 = vrot.lane.b32.xlu0 %v2351_v22, %s2639_s30 }
  0x58   : > { %2402 = vrot.lane.b32.xlu1 %v2401_v24, %s2642_s9 }
  0x59   : > { %2397 = vrot.lane.b32.xlu0 %v2401_v24, %s2641_s8 }
  0x5c   : > { %2412 = vrot.lane.b32.xlu1 %v2411_v25, %s2642_s9 }
  0x5d   : > { %2407 = vrot.lane.b32.xlu0 %v2411_v25, %s2641_s8 }
  0x60   : > { %2422 = vrot.lane.b32.xlu1 %v2411_v25, %s2643_s10 }
  0x61   : > { %2417 = vrot.lane.b32.xlu0 %v2401_v24, %s2643_s10 }
  0x65   : > { %381 = vrot.lane.b32.xlu0 %v269_v19, %s2642_s9 }
  0x86   : > { %v2787_v26 = vpop.permute.xlu1 %2237 }
  0x87   : > { %v2228_v27 = vpop.permute.xlu0 %2227  ;;  %v2239_v1 = vunpack.i.l.bf16 %v2787_v26 }
  0x88   : > { %v2229_v28 = vunpack.i.l.bf16 %v2228_v27  ;;  %v2230_v32 = vunpack.i.h.bf16 %v2228_v27 }
  0x8a   : > { %v2789_v29 = vpop.permute.xlu1 %2242  ;;  %v645_v30 = vpack.c.bf16 %v2229_v28, %v2229_v28  ;;  %v585_v37 = vsel %vm584_vm0, %v2229_v28, %v2230_v32 }
  0x8b   : > { %v2233_v31 = vpop.permute.xlu0 %2232  ;;  %v2244_v34 = vunpack.i.l.bf16 %v2789_v29  ;;  %v646_v43 = vpack.c.bf16 %v585_v37, %v585_v37  ;;  %v2245_v49 = vunpack.i.h.bf16 %v2789_v29 }
  0x8c   : > { %791 = vrot.lane.b32.xlu1 %v645_v30, %s2644_s11  ;;  %v2235_v39 = vunpack.i.h.bf16 %v2233_v31  ;;  %v2234_v40 = vunpack.i.l.bf16 %v2233_v31 }
  0x8d   : > { %v505_v59 = vsel %vm504_vm2, %v2244_v34, %v2245_v49 }
  0x8e   : > { %v2792_v33 = vpop.permute.xlu1 %2252  ;;  %v587_v44 = vsel %vm584_vm0, %v2234_v40, %v2235_v39  ;;  %v586_v63 = vsel %vm584_vm0, %v2230_v32, %v2234_v40  ;;  %v588_v27 = vsel %vm584_vm0, %v2235_v39, %v2239_v1 }
  0x8f   : > { %v2254_v35 = vunpack.i.l.bf16 %v2792_v33  ;;  %v2796_v36 = vpop.permute.xlu0 %2247  ;;  %v2255_v45 = vunpack.i.h.bf16 %v2792_v33  ;;  %v648_v48 = vpack.c.bf16 %v587_v44, %v587_v44  ;;  %v647_v22 = vpack.c.bf16 %v586_v63, %v586_v63 }
  0x90   : > { %v2250_v54 = vunpack.i.h.bf16 %v2796_v36  ;;  %v2249_v29 = vunpack.i.l.bf16 %v2796_v36  ;;  %v649_v36 = vpack.c.bf16 %v588_v27, %v588_v27 }
  0x91   : > { %v635_v38 = vpack.c.bf16 %v2254_v35, %v2244_v34  ;;  %v545_v53 = vsel %vm544_vm1, %v2254_v35, %v2255_v45 }
  0x92   : > { %v2799_v41 = vpop.permute.xlu1 %2262  ;;  %v636_v61 = vpack.c.bf16 %v545_v53, %v505_v59  ;;  %v506_v59 = vsel %vm504_vm2, %v2245_v49, %v2249_v29 }
  0x93   : > { %v2801_v42 = vpop.permute.xlu0 %2257  ;;  %771 = vrot.lane.b32.xlu0 %v635_v38, %s2644_s11  ;;  %v2264_v55 = vunpack.i.l.bf16 %v2799_v41 }
  0x94   : > { %v2260_v50 = vunpack.i.h.bf16 %v2801_v42  ;;  %v2259_v24 = vunpack.i.l.bf16 %v2801_v42 }
  0x95   : > { %v508_v12 = vsel %vm504_vm2, %v2250_v54, %v2264_v55 }
  0x96   : > { %v2806_v46 = vpop.permute.xlu1 %2272  ;;  %v546_v39 = vsel %vm544_vm1, %v2255_v45, %v2259_v24 }
  0x97   : > { %v2808_v47 = vpop.permute.xlu0 %2267  ;;  %793 = vrot.lane.b32.xlu0 %v646_v43, %s2644_s11  ;;  %v2274_v56 = vunpack.i.l.bf16 %v2806_v46  ;;  %v2275_v19 = vunpack.i.h.bf16 %v2806_v46 }
  0x98   : > { %v2269_v51 = vunpack.i.l.bf16 %v2808_v47 }
  0x9a   : > { %v2814_v52 = vpop.permute.xlu1 %2282  ;;  %v548_v0 = vsel %vm544_vm1, %v2260_v50, %v2269_v51 }
  0x9b   : > { %v2284_v57 = vunpack.i.l.bf16 %v2814_v52  ;;  %v2821_v58 = vpop.permute.xlu0 %2277  ;;  %797 = vrot.lane.b32.xlu0 %v648_v48, %s2644_s11  ;;  %v2285_v14 = vunpack.i.h.bf16 %v2814_v52  ;;  %v639_v23 = vpack.c.bf16 %v548_v0, %v508_v12  ;;  %v507_v0 = vsel %vm504_vm2, %v2249_v29, %v2250_v54 }
  0x9c   : > { %v2279_v10 = vunpack.i.l.bf16 %v2821_v58  ;;  %v2280_v15 = vunpack.i.h.bf16 %v2821_v58 }
  0x9d   : > { %v625_v60 = vpack.c.bf16 %v2284_v57, %v2274_v56 }
  0x9e   : > { %v2829_v62 = vpop.permute.xlu1 %2292  ;;  %v426_v31 = vsel %vm424_vm4, %v2275_v19, %v2279_v10  ;;  %v427_v34 = vsel %vm424_vm4, %v2279_v10, %v2280_v15  ;;  %v547_v10 = vsel %vm544_vm1, %v2259_v24, %v2260_v50  ;;  %v465_v50 = vsel %vm464_vm3, %v2284_v57, %v2285_v14 }
  0x9f   : > { %v2839_v11 = vpop.permute.xlu0 %2287  ;;  %751 = vrot.lane.b32.xlu1 %v625_v60, %s2644_s11  ;;  %773 = vrot.lane.b32.xlu0 %v636_v61, %s2644_s11  ;;  %v637_v61 = vpack.c.bf16 %v546_v39, %v506_v59  ;;  %v638_v42 = vpack.c.bf16 %v547_v10, %v507_v0 }
  0xa0   : > { %v2290_v16 = vunpack.i.h.bf16 %v2839_v11  ;;  %v2289_v17 = vunpack.i.l.bf16 %v2839_v11 }
  0xa2   : > { %v2852_v25 = vpop.permute.xlu1 %2302  ;;  %v466_v28 = vsel %vm464_vm3, %v2285_v14, %v2289_v17  ;;  %v467_v35 = vsel %vm464_vm3, %v2289_v17, %v2290_v16 }
  0xa3   : > { %v2859_v30 = vpop.permute.xlu0 %2297  ;;  %795 = vrot.lane.b32.xlu1 %v647_v22, %s2644_s11  ;;  %779 = vrot.lane.b32.xlu0 %v639_v23, %s2644_s11  ;;  %v2305_v32 = vunpack.i.h.bf16 %v2852_v25  ;;  %v2304_v33 = vunpack.i.l.bf16 %v2852_v25  ;;  %v627_v37 = vpack.c.bf16 %v466_v28, %v426_v31  ;;  %v628_v48 = vpack.c.bf16 %v467_v35, %v427_v34 }
  0xa4   : > { %v2294_v28 = vunpack.i.l.bf16 %v2829_v62  ;;  %v2299_v54 = vunpack.i.l.bf16 %v2859_v30  ;;  %v2240_v25 = vunpack.i.h.bf16 %v2787_v26 }
  0xa5   : > { %v342_v60 = vsel %vm340_vm5, %v2304_v33, %v2305_v32 }
  0xa6   : > { %v2313_v38 = vpop.permute.xlu1 %2312  ;;  %v428_v14 = vsel %vm424_vm4, %v2280_v15, %v2294_v28 }
  0xa7   : > { %v2315_v40 = vunpack.i.h.bf16 %v2313_v38  ;;  %v2314_v43 = vunpack.i.l.bf16 %v2313_v38  ;;  %v2873_v44 = vpop.permute.xlu0 %2307  ;;  %799 = vrot.lane.b32.xlu1 %v649_v36, %s2644_s11  ;;  %755 = vrot.lane.b32.xlu0 %v627_v37, %s2644_s11  ;;  %v425_v36 = vsel %vm424_vm4, %v2274_v56, %v2275_v19  ;;  %v468_v37 = vsel %vm464_vm3, %v2290_v16, %v2299_v54 }
  0xa8   : > { %v2310_v53 = vunpack.i.h.bf16 %v2873_v44  ;;  %v626_v57 = vpack.c.bf16 %v465_v50, %v425_v36  ;;  %v2309_v46 = vunpack.i.l.bf16 %v2873_v44 }
  0xa9   : > { %v385_v45 = vsel %vm383_vm6, %v2314_v43, %v2315_v40 }
  0xaa   : > { %v2883_v63 = vpop.permute.xlu1 %2322  ;;  %v616_v49 = vpack.c.bf16 %v385_v45, %v342_v60  ;;  %v341_v27 = vsel %vm340_vm5, %v2310_v53, %v2304_v33  ;;  %v343_v53 = vsel %vm340_vm5, %v2305_v32, %v2309_v46 }
  0xab   : > { %v2318_v12 = vpop.permute.xlu0 %2317  ;;  %775 = vrot.lane.b32.xlu1 %v637_v61, %s2644_s11  ;;  %757 = vrot.lane.b32.xlu0 %v628_v48, %s2644_s11  ;;  %v2325_v17 = vunpack.i.h.bf16 %v2883_v63  ;;  %v2324_v22 = vunpack.i.l.bf16 %v2883_v63 }
  0xac   : > { %v2320_v23 = vunpack.i.h.bf16 %v2318_v12  ;;  %v2319_v56 = vunpack.i.l.bf16 %v2318_v12 }
  0xad   : > { %v345_v52 = vsel %vm340_vm5, %v2324_v22, %v2325_v17  ;;  %v344_v32 = vsel %vm340_vm5, %v2309_v46, %v2324_v22 }
  0xae   : > { %v2896_v29 = vpop.permute.xlu1 %2332  ;;  %v384_v24 = vsel %vm383_vm6, %v2320_v23, %v2314_v43  ;;  %v629_v43 = vpack.c.bf16 %v468_v37, %v428_v14  ;;  %v386_v59 = vsel %vm383_vm6, %v2315_v40, %v2319_v56 }
  0xaf   : > { %v2902_v31 = vpop.permute.xlu0 %2327  ;;  %777 = vrot.lane.b32.xlu1 %v638_v42, %s2644_s11  ;;  %733 = vrot.lane.b32.xlu0 %v616_v49, %s2644_s11  ;;  %v615_v33 = vpack.c.bf16 %v384_v24, %v341_v27  ;;  %v2335_v19 = vunpack.i.h.bf16 %v2896_v29  ;;  %v2334_v45 = vunpack.i.l.bf16 %v2896_v29  ;;  %v617_v10 = vpack.c.bf16 %v386_v59, %v343_v53 }
  0xb0   : > { %v2330_v34 = vunpack.i.h.bf16 %v2902_v31  ;;  %v2329_v35 = vunpack.i.l.bf16 %v2902_v31  ;;  %v2645_v42 = vmov 0   ;;  %v589_v24 = vsel %vm584_vm0, %v2239_v1, %v2240_v25 }
  0xb1   : > { %v302_v23 = vsel %vm300_vm7, %v2334_v45, %v2335_v19  ;;  %964 = vmatprep.mubr.bf16.mxu0 %v2645_v42  ;;  %1005 = vmatprep.mubr.bf16.mxu1 %v2645_v42  ;;  %v650_v26 = vpack.c.bf16 %v589_v24, %v589_v24  ;;  %v2270_v1 = vunpack.i.h.bf16 %v2808_v47  ;;  %v2300_v59 = vunpack.i.h.bf16 %v2859_v30 }
  0xb2   : > { %v2926_v38 = vpop.permute.xlu1 %2342  ;;  %v388_v39 = vsel %vm383_vm6, %v2329_v35, %v2330_v34  ;;  %v387_v40 = vsel %vm383_vm6, %v2319_v56, %v2329_v35  ;;  %2426 = vset.pattern.permute.xlu1 %v2645_v42  ;;  %2627 = vset.pattern.permute.xlu0 %v2645_v42 }
  0xb3   : > { %v2338_v58 = vpop.permute.xlu0 %2337  ;;  %753 = vrot.lane.b32.xlu1 %v626_v57, %s2644_s11  ;;  %731 = vrot.lane.b32.xlu0 %v615_v33, %s2644_s11  ;;  %v619_v15 = vpack.c.bf16 %v388_v39, %v345_v52  ;;  %v2344_v11 = vunpack.i.l.bf16 %v2926_v38  ;;  %v618_v27 = vpack.c.bf16 %v387_v40, %v344_v32  ;;  %v606_v33 = vpack.c.bf16 %v302_v23, %v260_v7 }
  0xb4   : > { %v2339_v16 = vunpack.i.l.bf16 %v2338_v58  ;;  %v2340_v22 = vunpack.i.h.bf16 %v2338_v58  ;;  %v2345_v35 = vunpack.i.h.bf16 %v2926_v38  ;;  %v2265_v7 = vunpack.i.h.bf16 %v2799_v41 }
  0xb5   : > { %v469_v40 = vsel %vm464_vm3, %v2299_v54, %v2300_v59 }
  0xb6   : > { %v2934_v44 = vpop.permute.xlu1 %2352  ;;  %v303_v48 = vsel %vm300_vm7, %v2335_v19, %v2339_v16  ;;  %v304_v0 = vsel %vm300_vm7, %v2339_v16, %v2344_v11  ;;  %v301_v57 = vsel %vm300_vm7, %v2340_v22, %v2334_v45  ;;  %v305_v19 = vsel %vm300_vm7, %v2344_v11, %v2345_v35 }
  0xb7   : > { %v2941_v60 = vpop.permute.xlu0 %2347  ;;  %759 = vrot.lane.b32.xlu1 %v629_v43, %s2644_s11  ;;  %739 = vrot.lane.b32.xlu0 %v619_v15, %s2644_s11  ;;  %v607_v61 = vpack.c.bf16 %v303_v48, %v261_v8  ;;  %v608_v5 = vpack.c.bf16 %v304_v0, %v2715_v9  ;;  %v605_v39 = vpack.c.bf16 %v301_v57, %v259_v13 }
  0xb8   : > { %v2350_v8 = vunpack.i.h.bf16 %v2941_v60  ;;  %v2349_v29 = vunpack.i.l.bf16 %v2941_v60  ;;  %v549_v16 = vsel %vm544_vm1, %v2269_v51, %v2270_v1  ;;  %v609_v11 = vpack.c.bf16 %v305_v19, %v2710_v6 }
  0xb9   : > { %v509_v2 = vsel %vm504_vm2, %v2264_v55, %v2265_v7  ;;  %v2295_v51 = vunpack.i.h.bf16 %v2829_v62  ;;  %v2354_v60 = vunpack.i.l.bf16 %v2934_v44 }
  0xba   : > { %v2950_v12 = vpop.permute.xlu1 %2362  ;;  %v591_v36 = vsel %vm584_vm0, %v2349_v29, %v2350_v8  ;;  %v640_v53 = vpack.c.bf16 %v549_v16, %v509_v2 }
  0xbb   : > { %v2954_v49 = vpop.permute.xlu0 %2357  ;;  %715 = vrot.lane.b32.xlu0 %v607_v61, %s2644_s11  ;;  %735 = vrot.lane.b32.xlu1 %v617_v10, %s2644_s11  ;;  %v652_v37 = vpack.c.bf16 %v591_v36, %v591_v36  ;;  %v2365_v46 = vunpack.i.h.bf16 %v2950_v12  ;;  %v2364_v58 = vunpack.i.l.bf16 %v2950_v12  ;;  %v590_v61 = vsel %vm584_vm0, %v2240_v25, %v2349_v29 }
  0xbc   : > { %v2360_v56 = vunpack.i.h.bf16 %v2954_v49  ;;  %v2359_v15 = vunpack.i.l.bf16 %v2954_v49  ;;  %v651_v10 = vpack.c.bf16 %v590_v61, %v590_v61  ;;  %v429_v12 = vsel %vm424_vm4, %v2294_v28, %v2295_v51 }
  0xbd   : > { %v551_v47 = vsel %vm544_vm1, %v2364_v58, %v2365_v46  ;;  %v592_v49 = vsel %vm584_vm0, %v2350_v8, %v2354_v60  ;;  %v630_v23 = vpack.c.bf16 %v469_v40, %v429_v12  ;;  %v550_v54 = vsel %vm544_vm1, %v2270_v1, %v2364_v58 }
  0xbe   : > { %v2964_v50 = vpop.permute.xlu1 %2372  ;;  %v511_v13 = vsel %vm504_vm2, %v2359_v15, %v2360_v56  ;;  %v510_v30 = vsel %vm504_vm2, %v2265_v7, %v2359_v15 }
  0xbf   : > { %v2971_v9 = vpop.permute.xlu0 %2367  ;;  %717 = vrot.lane.b32.xlu0 %v608_v5, %s2644_s11  ;;  %737 = vrot.lane.b32.xlu1 %v618_v27, %s2644_s11  ;;  %v642_v6 = vpack.c.bf16 %v551_v47, %v511_v13  ;;  %v653_v27 = vpack.c.bf16 %v592_v49, %v592_v49  ;;  %v2374_v8 = vunpack.i.l.bf16 %v2964_v50 }
  0xc0   : > { %v2369_v29 = vunpack.i.l.bf16 %v2971_v9 }
  0xc2   : > { %v2980_v52 = vpop.permute.xlu1 %2382  ;;  %v512_v19 = vsel %vm504_vm2, %v2360_v56, %v2369_v29 }
  0xc3   : > { %v2983_v14 = vpop.permute.xlu0 %2377  ;;  %801 = vrot.lane.b32.xlu0 %v650_v26, %s2644_s11  ;;  %713 = vrot.lane.b32.xlu1 %v606_v33, %s2644_s11  ;;  %v2385_v41 = vunpack.i.h.bf16 %v2980_v52  ;;  %v2384_v32 = vunpack.i.l.bf16 %v2980_v52 }
  0xc4   : > { %v2380_v55 = vunpack.i.h.bf16 %v2983_v14  ;;  %v2379_v25 = vunpack.i.l.bf16 %v2983_v14  ;;  %v641_v14 = vpack.c.bf16 %v550_v54, %v510_v30 }
  0xc5   : > { %v471_v28 = vsel %vm464_vm3, %v2384_v32, %v2385_v41 }
  0xc6   : > { %v3000_v43 = vpop.permute.xlu1 %2392  ;;  %v431_v62 = vsel %vm424_vm4, %v2379_v25, %v2380_v55 }
  0xc7   : > { %v3002_v48 = vpop.permute.xlu0 %2387  ;;  %805 = vrot.lane.b32.xlu0 %v652_v37, %s2644_s11  ;;  %711 = vrot.lane.b32.xlu1 %v605_v39, %s2644_s11  ;;  %v632_v36 = vpack.c.bf16 %v471_v28, %v431_v62  ;;  %v552_v39 = vsel %vm544_vm1, %v2365_v46, %v2374_v8  ;;  %v2394_v56 = vunpack.i.l.bf16 %v3000_v43  ;;  %v430_v46 = vsel %vm424_vm4, %v2295_v51, %v2379_v25 }
  0xc8   : > { %v643_v15 = vpack.c.bf16 %v552_v39, %v512_v19  ;;  %v2395_v62 = vunpack.i.h.bf16 %v3000_v43  ;;  %v2390_v28 = vunpack.i.h.bf16 %v3002_v48 }
  0xca   : > { %v2403_v0 = vpop.permute.xlu1 %2402  ;;  %v473_v54 = vsel %vm464_vm3, %v2394_v56, %v2395_v62 }
  0xcb   : > { %v3016_v45 = vpop.permute.xlu0 %2397  ;;  %781 = vrot.lane.b32.xlu0 %v640_v53, %s2644_s11  ;;  %719 = vrot.lane.b32.xlu1 %v609_v11, %s2644_s11  ;;  %v2404_v24 = vunpack.i.l.bf16 %v2403_v0  ;;  %v2405_v26 = vunpack.i.h.bf16 %v2403_v0  ;;  %v2389_v11 = vunpack.i.l.bf16 %v3002_v48 }
  0xcc   : > { %v2399_v33 = vunpack.i.l.bf16 %v3016_v45  ;;  %v2400_v52 = vunpack.i.h.bf16 %v3016_v45 }
  0xcd   : > { %v389_v7 = vsel %vm383_vm6, %v2330_v34, %v2404_v24  ;;  %v470_v34 = vsel %vm464_vm3, %v2300_v59, %v2384_v32  ;;  %v432_v45 = vsel %vm424_vm4, %v2380_v55, %v2389_v11  ;;  %v390_v51 = vsel %vm383_vm6, %v2404_v24, %v2405_v26 }
  0xce   : > { %v3041_v22 = vpop.permute.xlu1 %2412  ;;  %v346_v37 = vsel %vm340_vm5, %v2325_v17, %v2399_v33  ;;  %v631_v61 = vpack.c.bf16 %v470_v34, %v430_v46  ;;  %v347_v38 = vsel %vm340_vm5, %v2399_v33, %v2400_v52  ;;  %v2355_v55 = vunpack.i.h.bf16 %v2934_v44 }
  0xcf   : > { %785 = vrot.lane.b32.xlu0 %v642_v6, %s2644_s11  ;;  %803 = vrot.lane.b32.xlu1 %v651_v10, %s2644_s11  ;;  %v3037_v5 = vpop.permute.xlu0 %2407  ;;  %v2414_v1 = vunpack.i.l.bf16 %v3041_v22  ;;  %v620_v31 = vpack.c.bf16 %v389_v7, %v346_v37  ;;  %v472_v6 = vsel %vm464_vm3, %v2385_v41, %v2394_v56  ;;  %v2415_v10 = vunpack.i.h.bf16 %v3041_v22 }
  0xd0   : > { %v2409_v57 = vunpack.i.l.bf16 %v3037_v5  ;;  %v2410_v0 = vunpack.i.h.bf16 %v3037_v5  ;;  %v633_v32 = vpack.c.bf16 %v472_v6, %v432_v45  ;;  %v621_v25 = vpack.c.bf16 %v390_v51, %v347_v38 }
  0xd1   : > { %v391_v17 = vsel %vm383_vm6, %v2405_v26, %v2414_v1  ;;  %v392_v49 = vsel %vm383_vm6, %v2414_v1, %v2415_v10  ;;  %v433_v30 = vsel %vm424_vm4, %v2389_v11, %v2390_v28  ;;  %v2370_v22 = vunpack.i.h.bf16 %v2971_v9 }
  0xd2   : > { %v348_v63 = vsel %vm340_vm5, %v2400_v52, %v2409_v57  ;;  %v2423_v16 = vpop.permute.xlu1 %2422  ;;  %v349_v40 = vsel %vm340_vm5, %v2409_v57, %v2410_v0  ;;  %v634_v48 = vpack.c.bf16 %v473_v54, %v433_v30 }
  0xd3   : > { %761 = vrot.lane.b32.xlu0 %v630_v23, %s2644_s11  ;;  %807 = vrot.lane.b32.xlu1 %v653_v27, %s2644_s11  ;;  %v2418_v58 = vpop.permute.xlu0 %2417  ;;  %v622_v13 = vpack.c.bf16 %v391_v17, %v348_v63  ;;  %v2424_v53 = vunpack.i.l.bf16 %v2423_v16  ;;  %v623_v5 = vpack.c.bf16 %v392_v49, %v349_v40  ;;  %v2425_v23 = vunpack.i.h.bf16 %v2423_v16 }
  0xd4   : > { %v2419_v2 = vunpack.i.l.bf16 %v2418_v58  ;;  %v2420_v47 = vunpack.i.h.bf16 %v2418_v58 }
  0xd5   : > { %v309_v43 = vsel %vm300_vm7, %v2424_v53, %v2425_v23  ;;  %v614_v33 = vpack.c.bf16 %v2425_v23, %v2754_v18  ;;  %v655_v18 = vld [vmem:[%s3717_s3] sm:$0xff] }
  0xd6   : > { %v306_v59 = vsel %vm300_vm7, %v2345_v35, %v2419_v2  ;;  %v308_v12 = vsel %vm300_vm7, %v2420_v47, %v2424_v53  ;;  %v613_v24 = vpack.c.bf16 %v309_v43, %v2759_v21 }
  0xd7   : > { %765 = vrot.lane.b32.xlu0 %v632_v36, %s2644_s11  ;;  %783 = vrot.lane.b32.xlu1 %v641_v14, %s2644_s11  ;;  %v610_v35 = vpack.c.bf16 %v306_v59, %v2703_v3  ;;  %v612_v41 = vpack.c.bf16 %v308_v12, %v2756_v20  ;;  %v593_v3 = vsel %vm584_vm0, %v2354_v60, %v2355_v55  ;;  %v2375_v60 = vunpack.i.h.bf16 %v2964_v50  ;;  %v382_v26 = vpop.permute.xlu0 %381 }
  0xd8   : > { %v307_v20 = vsel %vm300_vm7, %v2419_v2, %v2420_v47  ;;  %v654_v27 = vpack.c.bf16 %v593_v3, %v593_v3  ;;  %v513_v36 = vsel %vm504_vm2, %v2369_v29, %v2370_v22  ;;  %v393_v57 = vsel %vm383_vm6, %v2415_v10, %v382_v26 }
  0xd9   : > { %v611_v44 = vpack.c.bf16 %v307_v20, %v2705_v4  ;;  %v553_v4 = vsel %vm544_vm1, %v2374_v8, %v2375_v60  ;;  %v624_v21 = vpack.c.bf16 %v393_v57, %v2410_v0 }
  0xda   : > { %v644_v52 = vpack.c.bf16 %v553_v4, %v513_v36 }
  0xdb   : > { %741 = vrot.lane.b32.xlu0 %v620_v31, %s2644_s11  ;;  %787 = vrot.lane.b32.xlu1 %v643_v15, %s2644_s11 }
  0xdf   : > { %745 = vrot.lane.b32.xlu0 %v622_v13, %s2644_s11  ;;  %763 = vrot.lane.b32.xlu1 %v631_v61, %s2644_s11 }
  0xe3   : > { %721 = vrot.lane.b32.xlu0 %v610_v35, %s2644_s11  ;;  %767 = vrot.lane.b32.xlu1 %v633_v32, %s2644_s11 }
  0xe7   : > { %725 = vrot.lane.b32.xlu0 %v612_v41, %s2644_s11  ;;  %743 = vrot.lane.b32.xlu1 %v621_v25, %s2644_s11 }
  0xeb   : > { %809 = vrot.lane.b32.xlu0 %v654_v27, %s2644_s11  ;;  %747 = vrot.lane.b32.xlu1 %v623_v5, %s2644_s11  ;;  %v3160_v27 = vld [vmem:[%s3716_s2] sm:$0xf] }
  0xef   : > { %769 = vrot.lane.b32.xlu0 %v634_v48, %s2644_s11  ;;  %723 = vrot.lane.b32.xlu1 %v611_v44, %s2644_s11 }
  0xf3   : > { %727 = vrot.lane.b32.xlu1 %v613_v24, %s2644_s11  ;;  %729 = vrot.lane.b32.xlu0 %v614_v33, %s2644_s11 }
  0xf7   : > { %789 = vrot.lane.b32.xlu1 %v644_v52, %s2644_s11 }
  0xfb   : > { %749 = vrot.lane.b32.xlu1 %v624_v21, %s2644_s11 }
  0xfe   : > { %v792_v8 = vpop.permute.xlu1 %791 }
  0xff   : > { %658 = vperm.xlu1 %2426, %v655_v18  }
 0x105   : > { %v772_v50 = vpop.permute.xlu0 %771 }
 0x109   : > { %v794_v9 = vpop.permute.xlu0 %793 }
 0x10a   : > { %v848_v37 = vsel %vm811_vm8, %v792_v8, %v794_v9 }
 0x10b   : > { %v903_v58 = vsel %vm901_vm9, %v848_v37, 0 }
 0x10d   : > { %v798_v29 = vpop.permute.xlu0 %797 }
 0x111   : > { %v752_v1 = vpop.permute.xlu1 %751  ;;  %v774_v14 = vpop.permute.xlu0 %773 }
 0x112   : > { %v839_v2 = vsel %vm811_vm8, %v772_v50, %v774_v14 }
 0x115   : > { %v796_v7 = vpop.permute.xlu1 %795  ;;  %v3127_v19 = vpop.permute.xlu0 %779 }
 0x116   : > { %v849_v39 = vsel %vm811_vm8, %v794_v9, %v796_v7  ;;  %v850_v63 = vsel %vm811_vm8, %v796_v7, %v798_v29 }
 0x117   : > { %2183 = vmatprep.subr.msk.bf16.mxu0 %vm901_vm9, %v849_v39  ;;  %v909_v34 = vsel %vm901_vm9, %v850_v63, 0 }
 0x118   : > { %939 = vmatpush1.bf16.msra.mxu0 %v903_v58 }
 0x119   : > { %v800_v17 = vpop.permute.xlu1 %799  ;;  %v756_v31 = vpop.permute.xlu0 %755 }
 0x11a   : > { %v851_v15 = vsel %vm811_vm8, %v798_v29, %v800_v17 }
 0x11b   : > { %2185 = vmatprep.subr.msk.bf16.mxu1 %vm901_vm9, %v851_v15 }
 0x11c   : > { %980 = vmatpush1.bf16.msra.mxu1 %v909_v34 }
 0x11d   : > { %v776_v16 = vpop.permute.xlu1 %775  ;;  %v758_v56 = vpop.permute.xlu0 %757 }
 0x11e   : > { %v840_v11 = vsel %vm811_vm8, %v774_v14, %v776_v16  ;;  %v832_v12 = vsel %vm811_vm8, %v756_v31, %v758_v56 }
 0x11f   : > { %940 = vmatprep.subr.bf16.mxu0 %v840_v11 }
 0x120   : > { %941 = vmatpush1.bf16.msra.mxu0 %v839_v2 }
 0x121   : > { %v778_v46 = vpop.permute.xlu1 %777  ;;  %v734_v13 = vpop.permute.xlu0 %733 }
 0x122   : > { %v842_v47 = vsel %vm811_vm8, %v778_v46, %v3127_v19  ;;  %v841_v53 = vsel %vm811_vm8, %v776_v16, %v778_v46 }
 0x123   : > { %981 = vmatprep.subr.bf16.mxu1 %v842_v47 }
 0x124   : > { %982 = vmatpush1.bf16.msra.mxu1 %v841_v53 }
 0x125   : > { %v754_v61 = vpop.permute.xlu1 %753  ;;  %v732_v59 = vpop.permute.xlu0 %731 }
 0x126   : > { %v831_v45 = vsel %vm811_vm8, %v754_v61, %v756_v31  ;;  %v830_v6 = vsel %vm811_vm8, %v752_v1, %v754_v61  ;;  %v821_v55 = vsel %vm811_vm8, %v732_v59, %v734_v13 }
 0x127   : > { %942 = vmatprep.subr.bf16.mxu0 %v831_v45 }
 0x128   : > { %943 = vmatpush1.bf16.msra.mxu0 %v830_v6 }
 0x129   : > { %v3143_v51 = vpop.permute.xlu1 %759  ;;  %v3145_v0 = vpop.permute.xlu0 %739 }
 0x12a   : > { %v833_v10 = vsel %vm811_vm8, %v758_v56, %v3143_v51 }
 0x12b   : > { %983 = vmatprep.subr.bf16.mxu1 %v833_v10 }
 0x12c   : > { %984 = vmatpush1.bf16.msra.mxu1 %v832_v12 }
 0x12d   : > { %v716_v38 = vpop.permute.xlu0 %715  ;;  %v736_v35 = vpop.permute.xlu1 %735 }
 0x12e   : > { %v822_v32 = vsel %vm811_vm8, %v734_v13, %v736_v35 }
 0x12f   : > { %944 = vmatprep.subr.bf16.mxu0 %v822_v32 }
 0x130   : > { %945 = vmatpush1.bf16.msra.mxu0 %v821_v55 }
 0x131   : > { %v718_v41 = vpop.permute.xlu0 %717  ;;  %v738_v25 = vpop.permute.xlu1 %737 }
 0x132   : > { %v824_v40 = vsel %vm811_vm8, %v738_v25, %v3145_v0  ;;  %v823_v49 = vsel %vm811_vm8, %v736_v35, %v738_v25  ;;  %v814_v43 = vsel %vm811_vm8, %v716_v38, %v718_v41 }
 0x133   : > { %985 = vmatprep.subr.bf16.mxu1 %v824_v40  ;;  %v2646_v40 = vmov 0.0  }
 0x134   : > { %986 = vmatpush1.bf16.msra.mxu1 %v823_v49  ;;  %1221 = vst [vmem:[#allocation2 + $0x50] sm:$0xff] %v2646_v40  ;;  %v1151_v49 = vlaneseq }
 0x135   : > { %v802_v62 = vpop.permute.xlu0 %801  ;;  %v714_v28 = vpop.permute.xlu1 %713 }
 0x136   : > { %v813_v3 = vsel %vm811_vm8, %v714_v28, %v716_v38  ;;  %v852_v48 = vsel %vm811_vm8, %v800_v17, %v802_v62 }
 0x137   : > { %946 = vmatprep.subr.bf16.mxu0 %v813_v3  ;;  %v915_v33 = vsel %vm901_vm9, %v852_v48, 0 }
 0x139   : > { %v806_v5 = vpop.permute.xlu0 %805  ;;  %v712_v23 = vpop.permute.xlu1 %711 }
 0x13a   : > { %v812_v20 = vsel %vm811_vm8, %v712_v23, %v714_v28 }
 0x13b   : > { %947 = vmatpush1.bf16.msra.mxu0 %v812_v20 }
 0x13d   : > { %v782_v30 = vpop.permute.xlu0 %781  ;;  %v3162_v54 = vpop.permute.xlu1 %719 }
 0x13e   : > { %2184 = vmatmul.mubr.msk.bf16.vlgmr.msra.gmra.mxu0 %vm897_vm10, %v3160_v27  ;;  %v815_v44 = vsel %vm811_vm8, %v718_v41, %v3162_v54  ;;  %v843_v9 = vsel %vm811_vm8, %v3127_v19, %v782_v30 }
 0x13f   : > { %987 = vmatprep.subr.bf16.mxu1 %v815_v44  ;;  %1046 = vmatprep.mubr.bf16.mxu0 %v2645_v42 }
 0x140   : > { %988 = vmatpush1.bf16.msra.mxu1 %v814_v43 }
 0x141   : > { %v786_v60 = vpop.permute.xlu0 %785  ;;  %v804_v22 = vpop.permute.xlu1 %803 }
 0x142   : > { %v853_v24 = vsel %vm811_vm8, %v802_v62, %v804_v22  ;;  %v854_v36 = vsel %vm811_vm8, %v804_v22, %v806_v5  ;;  %v3218_v62 = vshrl.u32 %v1151_v49, 7 }
 0x143   : > { %2186 = vmatmul.mubr.msk.bf16.vlgmr.msra.gmra.mxu1 %vm897_vm10, %v3160_v27  ;;  %2187 = vmatprep.subr.msk.bf16.mxu0 %vm901_vm9, %v853_v24  ;;  %v921_v57 = vsel %vm901_vm9, %v854_v36, 0 }
 0x144   : > { %1021 = vmatpush1.bf16.msra.mxu0 %v915_v33  ;;  %1087 = vmatprep.mubr.bf16.mxu1 %v2645_v42  ;;  %v1153_v28 = vsub.s32 0, %v3218_v62  ;;  %v1157_v23 = vsub.s32 1, %v3218_v62  ;;  %v1161_v44 = vsub.s32 2, %v3218_v62  ;;  %v1165_v24 = vsub.s32 3, %v3218_v62 }
 0x145   : > { %v762_v4 = vpop.permute.xlu0 %761  ;;  %v808_v26 = vpop.permute.xlu1 %807 }
 0x146   : > { %v855_v52 = vsel %vm811_vm8, %v806_v5, %v808_v26  ;;  %v834_v58 = vsel %vm811_vm8, %v3143_v51, %v762_v4  ;;  %v3226_v5 = vld [vmem:[%s3715_s1] sm:$0xff] }
 0x147   : > { %2189 = vmatprep.subr.msk.bf16.mxu1 %vm901_vm9, %v855_v52  ;;  %v1162_v52 = vrot.slane %v3226_v5, %v1161_v44 }
 0x148   : > { %1062 = vmatpush1.bf16.msra.mxu1 %v921_v57 }
 0x149   : > { %v766_v21 = vpop.permute.xlu0 %765  ;;  %v784_v18 = vpop.permute.xlu1 %783 }
 0x14a   : > { %v844_v50 = vsel %vm811_vm8, %v782_v30, %v784_v18  ;;  %v845_v14 = vsel %vm811_vm8, %v784_v18, %v786_v60  ;;  %v1154_v30 = vrot.slane %v3226_v5, %v1153_v28 }
 0x14b   : > { %1022 = vmatprep.subr.bf16.mxu0 %v844_v50 }
 0x14c   : > { %1023 = vmatpush1.bf16.msra.mxu0 %v843_v9 }
 0x14d   : > { %v742_v8 = vpop.permute.xlu0 %741  ;;  %v788_v29 = vpop.permute.xlu1 %787 }
 0x14e   : > { %v846_v1 = vsel %vm811_vm8, %v786_v60, %v788_v29  ;;  %v825_v56 = vsel %vm811_vm8, %v3145_v0, %v742_v8  ;;  %v1158_v60 = vrot.slane %v3226_v5, %v1157_v23 }
 0x14f   : > { %1063 = vmatprep.subr.bf16.mxu1 %v846_v1 }
 0x150   : > { %1064 = vmatpush1.bf16.msra.mxu1 %v845_v14 }
 0x151   : > { %v746_v37 = vpop.permute.xlu0 %745  ;;  %v764_v7 = vpop.permute.xlu1 %763 }
 0x152   : > { %v835_v39 = vsel %vm811_vm8, %v762_v4, %v764_v7  ;;  %v836_v31 = vsel %vm811_vm8, %v764_v7, %v766_v21 }
 0x153   : > { %1024 = vmatprep.subr.bf16.mxu0 %v835_v39 }
 0x154   : > { %1025 = vmatpush1.bf16.msra.mxu0 %v834_v58 }
 0x155   : > { %v722_v63 = vpop.permute.xlu0 %721  ;;  %v768_v19 = vpop.permute.xlu1 %767 }
 0x156   : > { %v837_v17 = vsel %vm811_vm8, %v766_v21, %v768_v19  ;;  %v816_v61 = vsel %vm811_vm8, %v3162_v54, %v722_v63 }
 0x157   : > { %1065 = vmatprep.subr.bf16.mxu1 %v837_v17  ;;  %v1173_v17 = vsub.s32 5, %v3218_v62 }
 0x158   : > { %1066 = vmatpush1.bf16.msra.mxu1 %v836_v31 }
 0x159   : > { %v744_v15 = vpop.permute.xlu1 %743  ;;  %v726_v16 = vpop.permute.xlu0 %725 }
 0x15a   : > { %v826_v34 = vsel %vm811_vm8, %v742_v8, %v744_v15  ;;  %v827_v46 = vsel %vm811_vm8, %v744_v15, %v746_v37  ;;  %v1166_v8 = vrot.slane %v3226_v5, %v1165_v24 }
 0x15b   : > { %1026 = vmatprep.subr.bf16.mxu0 %v826_v34 }
 0x15c   : > { %1027 = vmatpush1.bf16.msra.mxu0 %v825_v56 }
 0x15d   : > { %v748_v11 = vpop.permute.xlu1 %747  ;;  %v810_v13 = vpop.permute.xlu0 %809 }
 0x15e   : > { %v828_v2 = vsel %vm811_vm8, %v746_v37, %v748_v11  ;;  %v856_v59 = vsel %vm811_vm8, %v808_v26, %v810_v13 }
 0x15f   : > { %1067 = vmatprep.subr.bf16.mxu1 %v828_v2  ;;  %v927_v51 = vsel %vm901_vm9, %v856_v59, 0 }
 0x160   : > { %1068 = vmatpush1.bf16.msra.mxu1 %v827_v46 }
 0x161   : > { %v724_v47 = vpop.permute.xlu1 %723  ;;  %v770_v38 = vpop.permute.xlu0 %769 }
 0x162   : > { %v817_v53 = vsel %vm811_vm8, %v722_v63, %v724_v47  ;;  %v818_v0 = vsel %vm811_vm8, %v724_v47, %v726_v16  ;;  %v838_v35 = vsel %vm811_vm8, %v768_v19, %v770_v38  ;;  %v1169_v19 = vsub.s32 4, %v3218_v62 }
 0x163   : > { %1028 = vmatprep.subr.bf16.mxu0 %v817_v53 }
 0x164   : > { %1029 = vmatpush1.bf16.msra.mxu0 %v816_v61  ;;  %v1170_v34 = vrot.slane %v3226_v5, %v1169_v19 }
 0x165   : > { %2191 = vmatprep.subr.msk.bf16.mxu0 %vm901_vm9, %v810_v13  ;;  %v728_v45 = vpop.permute.xlu1 %727  ;;  %v730_v55 = vpop.permute.xlu0 %729  ;;  %v1174_v13 = vrot.slane %v3226_v5, %v1173_v17 }
 0x166   : > { %v819_v6 = vsel %vm811_vm8, %v726_v16, %v728_v45  ;;  %v820_v25 = vsel %vm811_vm8, %v728_v45, %v730_v55  ;;  %v1177_v16 = vsub.s32 6, %v3218_v62 }
 0x167   : > { %2188 = vmatmul.mubr.msk.bf16.vlgmr.msra.gmra.mxu0 %vm897_vm10, %v3160_v27  ;;  %1069 = vmatprep.subr.bf16.mxu1 %v819_v6 }
 0x168   : > { %1070 = vmatpush1.bf16.msra.mxu1 %v818_v0  ;;  %1103 = vmatpush1.bf16.msra.mxu0 %v927_v51  ;;  %v1178_v6 = vrot.slane %v3226_v5, %v1177_v16 }
 0x169   : > { %v790_v10 = vpop.permute.xlu1 %789  ;;  %1128 = vmatprep.mubr.bf16.mxu0 %v2645_v42 }
 0x16a   : > { %v847_v12 = vsel %vm811_vm8, %v788_v29, %v790_v10  ;;  %1104 = vmatprep.subr.bf16.mxu0 %v790_v10 }
 0x16b   : > { %2190 = vmatmul.mubr.msk.bf16.vlgmr.msra.gmra.mxu1 %vm897_vm10, %v3160_v27 }
 0x16c   : > { %1105 = vmatpush1.bf16.msra.mxu0 %v847_v12  ;;  %1928 = vmatprep.mubr.bf16.mxu1 %v2645_v42 }
 0x16d   : > { %1106 = vmatprep.subr.bf16.mxu0 %v770_v38  ;;  %v750_v32 = vpop.permute.xlu1 %749 }
 0x16e   : > { %v829_v41 = vsel %vm811_vm8, %v748_v11, %v750_v32  ;;  %v1181_v11 = vsub.s32 7, %v3218_v62 }
 0x170   : > { %1107 = vmatpush1.bf16.msra.mxu0 %v838_v35  ;;  %v1182_v10 = vrot.slane %v3226_v5, %v1181_v11 }
 0x171   : > { %1108 = vmatprep.subr.bf16.mxu0 %v750_v32 }
 0x174   : > { %1109 = vmatpush1.bf16.msra.mxu0 %v829_v41 }
 0x175   : > { %1110 = vmatprep.subr.bf16.mxu0 %v730_v55 }
 0x178   : > { %1111 = vmatpush1.bf16.msra.mxu0 %v820_v25 }
 0x17a   : > { %v3221_v3 = vpop.permute.xlu1 %658 }
 0x17b   : > { %2192 = vmatmul.mubr.msk.bf16.vlgmr.msra.gmra.mxu0 %vm897_vm10, %v3160_v27 }
 0x17c   : > { %1969 = vmatprep.mubr.bf16.mxu0 %v2645_v42 }
 0x1fe   : > { %v966_v20 = vpop.f32.mrf.mxu0 }
 0x1ff   : > { %v967_v27 = vadd.f32 %v966_v20, %v3221_v3 }
 0x200   : > { %v968_v54 = vpop.f32.mrf.mxu0 }
 0x201   : > { %v969_v43 = vadd.f32 %v968_v54, %v3221_v3  ;;  %v1137_v48 = vmax.f32 %v967_v27, 0.0  ;;  %v1148_v27 = vld [vmem:[%s3715_s1 + $0x8] sm:$0x3] }
 0x202   : > { %v970_v22 = vpop.f32.mrf.mxu0  ;;  %v1190_v24 = vrot.slane %v1148_v27, %v1157_v23 }
 0x203   : > { %v1138_v33 = vmax.f32 %v969_v43, 0.0  ;;  %v1007_v36 = vpop.f32.mrf.mxu1  ;;  %v3239_v4 = vmul.f32 %v1154_v30, %v1137_v48  ;;  %v1186_v43 = vrot.slane %v1148_v27, %v1153_v28 }
 0x204   : > { %v1008_v26 = vadd.f32 %v1007_v36, %v3221_v3  ;;  %v971_v57 = vpop.f32.mrf.mxu0 }
 0x205   : > { %v3243_v21 = vmul.f32 %v1158_v60, %v1138_v33  ;;  %v1009_v18 = vpop.f32.mrf.mxu1 }
 0x206   : > { %v1139_v50 = vmax.f32 %v1008_v26, 0.0  ;;  %v1010_v9 = vadd.f32 %v1009_v18, %v3221_v3 }
 0x207   : > { %v1011_v29 = vpop.f32.mrf.mxu1  ;;  %v2442_v1 = vpack.i.bf16 %v3243_v21, %v3239_v4 }
 0x208   : > { %v3249_v14 = vmul.f32 %v1162_v52, %v1139_v50  ;;  %v1140_v37 = vmax.f32 %v1010_v9, 0.0 }
 0x209   : > { %v1012_v7 = vpop.f32.mrf.mxu1  ;;  %2443 = vrot.lane.b32.xlu0 %v2442_v1, %s2636_s27 }
 0x20a   : > { %v3252_v39 = vmul.f32 %v1166_v8, %v1140_v37  ;;  %v2427_v58 = vpack.i.bf16 %v2646_v40, %v3249_v14 }
 0x20c   : > { %2428 = vrot.lane.b32.xlu1 %v2427_v58, %s2641_s8  ;;  %v2447_v63 = vpack.i.bf16 %v3252_v39, %v3249_v14 }
 0x20d   : > { %2453 = vrot.lane.b32.xlu0 %v2442_v1, %s2637_s28 }
 0x210   : > { %2433 = vrot.lane.b32.xlu1 %v2427_v58, %s2642_s9 }
 0x211   : > { %2463 = vrot.lane.b32.xlu0 %v2442_v1, %s2638_s29 }
 0x214   : > { %2438 = vrot.lane.b32.xlu1 %v2427_v58, %s2643_s10 }
 0x215   : > { %2473 = vrot.lane.b32.xlu0 %v2442_v1, %s2639_s30 }
 0x218   : > { %2448 = vrot.lane.b32.xlu1 %v2447_v63, %s2636_s27 }
 0x219   : > { %2483 = vrot.lane.b32.xlu0 %v2442_v1, %s2640_s7 }
 0x21c   : > { %2458 = vrot.lane.b32.xlu1 %v2447_v63, %s2637_s28 }
 0x21d   : > { %2493 = vrot.lane.b32.xlu0 %v2442_v1, %s2641_s8 }
 0x220   : > { %2468 = vrot.lane.b32.xlu1 %v2447_v63, %s2638_s29 }
 0x221   : > { %2498 = vrot.lane.b32.xlu0 %v2442_v1, %s2642_s9 }
 0x224   : > { %2478 = vrot.lane.b32.xlu1 %v2447_v63, %s2639_s30 }
 0x225   : > { %2503 = vrot.lane.b32.xlu0 %v2442_v1, %s2643_s10 }
 0x227   : > { %v1048_v31 = vpop.f32.mrf.mxu0 }
 0x228   : > { %v1049_v15 = vadd.f32 %v1048_v31, %v3221_v3  ;;  %2488 = vrot.lane.b32.xlu1 %v2447_v63, %s2640_s7 }
 0x229   : > { %v1050_v56 = vpop.f32.mrf.mxu0 }
 0x22a   : > { %v1141_v2 = vmax.f32 %v1049_v15, 0.0  ;;  %v1051_v46 = vadd.f32 %v1050_v56, %v3221_v3 }
 0x22b   : > { %v1052_v47 = vpop.f32.mrf.mxu0  ;;  %v1089_v53 = vpop.f32.mrf.mxu1 }
 0x22c   : > { %v3281_v61 = vmul.f32 %v1170_v34, %v1141_v2  ;;  %v1142_v59 = vmax.f32 %v1051_v46, 0.0  ;;  %v1090_v45 = vadd.f32 %v1089_v53, %v3221_v3 }
 0x22d   : > { %v1053_v51 = vpop.f32.mrf.mxu0  ;;  %v1091_v0 = vpop.f32.mrf.mxu1 }
 0x22e   : > { %v3286_v12 = vmul.f32 %v1174_v13, %v1142_v59  ;;  %v1143_v38 = vmax.f32 %v1090_v45, 0.0  ;;  %v1092_v35 = vadd.f32 %v1091_v0, %v3221_v3  ;;  %v2507_v32 = vpack.i.bf16 %v3281_v61, %v3252_v39 }
 0x22f   : > { %v1093_v55 = vpop.f32.mrf.mxu1 }
 0x230   : > { %v3291_v41 = vmul.f32 %v1178_v6, %v1143_v38  ;;  %v1144_v25 = vmax.f32 %v1092_v35, 0.0  ;;  %2508 = vrot.lane.b32.xlu0 %v2507_v32, %s2641_s8  ;;  %v2522_v30 = vpack.i.bf16 %v3286_v12, %v3281_v61 }
 0x231   : > { %v1094_v49 = vpop.f32.mrf.mxu1 }
 0x232   : > { %v3294_v20 = vmul.f32 %v1182_v10, %v1144_v25  ;;  %v2572_v62 = vpack.i.bf16 %v3291_v41, %v3286_v12 }
 0x234   : > { %2513 = vrot.lane.b32.xlu0 %v2507_v32, %s2642_s9  ;;  %v2527_v5 = vpack.i.bf16 %v3294_v20, %v3291_v41 }
 0x236   : > { %2528 = vrot.lane.b32.xlu1 %v2527_v5, %s2636_s27 }
 0x238   : > { %2518 = vrot.lane.b32.xlu0 %v2507_v32, %s2643_s10 }
 0x23a   : > { %2538 = vrot.lane.b32.xlu1 %v2527_v5, %s2637_s28 }
 0x23b   : > { %v1130_v54 = vpop.f32.mrf.mxu0 }
 0x23c   : > { %v1131_v44 = vadd.f32 %v1130_v54, %v3221_v3  ;;  %2523 = vrot.lane.b32.xlu0 %v2522_v30, %s2636_s27 }
 0x23d   : > { %v1132_v48 = vpop.f32.mrf.mxu0 }
 0x23e   : > { %v1145_v60 = vmax.f32 %v1131_v44, 0.0  ;;  %v1133_v22 = vadd.f32 %v1132_v48, %v3221_v3  ;;  %2548 = vrot.lane.b32.xlu1 %v2527_v5, %s2638_s29 }
 0x23f   : > { %v1134_v33 = vpop.f32.mrf.mxu0 }
 0x240   : > { %v3315_v36 = vmul.f32 %v1186_v43, %v1145_v60  ;;  %v1146_v26 = vmax.f32 %v1133_v22, 0.0  ;;  %2533 = vrot.lane.b32.xlu0 %v2522_v30, %s2637_s28 }
 0x241   : > { %v1135_v52 = vpop.f32.mrf.mxu0 }
 0x242   : > { %v1210_v57 = vmul.f32 %v1190_v24, %v1146_v26  ;;  %2558 = vrot.lane.b32.xlu1 %v2527_v5, %s2639_s30  ;;  %v2592_v28 = vpack.i.bf16 %v3315_v36, %v3294_v20 }
 0x244   : > { %1233 = vst.msk [vmem:[#allocation2 + $0x50] sm:$0xff] %vm1222_vm11, %v1210_v57  ;;  %2543 = vrot.lane.b32.xlu0 %v2522_v30, %s2638_s29 }
 0x246   : > { %2568 = vrot.lane.b32.xlu1 %v2527_v5, %s2640_s7 }
 0x248   : > { %2553 = vrot.lane.b32.xlu0 %v2522_v30, %s2639_s30 }
 0x24a   : > { %2573 = vrot.lane.b32.xlu1 %v2572_v62, %s2641_s8 }
 0x24b   : > { %v1244_v3 = vld [vmem:[#allocation2 + $0x50] sm:$0xff] }
 0x24c   : > { %2563 = vrot.lane.b32.xlu0 %v2522_v30, %s2640_s7  ;;  %v2602_v23 = vpack.i.bf16 %v1244_v3, %v3315_v36 }
 0x24e   : > { %2578 = vrot.lane.b32.xlu1 %v2572_v62, %s2642_s9 }
 0x250   : > { %2593 = vrot.lane.b32.xlu0 %v2592_v28, %s2642_s9 }
 0x252   : > { %2583 = vrot.lane.b32.xlu1 %v2572_v62, %s2643_s10 }
 0x254   : > { %2598 = vrot.lane.b32.xlu0 %v2592_v28, %s2643_s10 }
 0x256   : > { %2588 = vrot.lane.b32.xlu1 %v2592_v28, %s2641_s8 }
 0x258   : > { %2603 = vrot.lane.b32.xlu0 %v2602_v23, %s2636_s27 }
 0x25a   : > { %2608 = vrot.lane.b32.xlu1 %v2602_v23, %s2637_s28 }
 0x25c   : > { %2613 = vrot.lane.b32.xlu0 %v2602_v23, %s2638_s29  ;;  %s3698_s29 = scalar_lea.vmem %s3720_s6, %s2206_s26 }
 0x25e   : > { %2618 = vrot.lane.b32.xlu1 %v2602_v23, %s2639_s30 }
 0x260   : > { %2623 = vrot.lane.b32.xlu0 %v2602_v23, %s2640_s7 }
 0x262   : > { %1354 = vrot.lane.b32.xlu1 %v1244_v3, %s2642_s9 }
 0x27b   : > { %v2444_v18 = vpop.permute.xlu0 %2443 }
 0x27c   : > { %v2445_v50 = vunpack.i.l.bf16 %v2444_v18  ;;  %v2446_v47 = vunpack.i.h.bf16 %v2444_v18 }
 0x27e   : > { %v1612_v9 = vpack.c.bf16 %v2445_v50, %v2445_v50  ;;  %v3341_v8 = vpop.permute.xlu1 %2428  ;;  %v1552_v38 = vsel %vm584_vm0, %v2445_v50, %v2446_v47 }
 0x27f   : > { %v2454_v29 = vpop.permute.xlu0 %2453  ;;  %v2431_v59 = vunpack.i.h.bf16 %v3341_v8  ;;  %v1613_v44 = vpack.c.bf16 %v1552_v38, %v1552_v38 }
 0x280   : > { %1758 = vrot.lane.b32.xlu1 %v1612_v9, %s2644_s11  ;;  %v2455_v7 = vunpack.i.l.bf16 %v2454_v29  ;;  %v2456_v27 = vunpack.i.h.bf16 %v2454_v29 }
 0x282   : > { %v3344_v1 = vpop.permute.xlu1 %2433  ;;  %v1474_v33 = vsel %vm504_vm2, %v2455_v7, %v2456_v27 }
 0x283   : > { %v2464_v37 = vpop.permute.xlu0 %2463  ;;  %v2436_v45 = vunpack.i.h.bf16 %v3344_v1 }
 0x284   : > { %v2465_v58 = vunpack.i.l.bf16 %v2464_v37  ;;  %v2466_v55 = vunpack.i.h.bf16 %v2464_v37 }
 0x286   : > { %v1602_v63 = vpack.c.bf16 %v2465_v58, %v2455_v7  ;;  %v3346_v19 = vpop.permute.xlu1 %2438  ;;  %v1513_v48 = vsel %vm544_vm1, %v2465_v58, %v2466_v55 }
 0x287   : > { %v3348_v17 = vpop.permute.xlu0 %2473  ;;  %v2441_v25 = vunpack.i.h.bf16 %v3346_v19 }
 0x288   : > { %1738 = vrot.lane.b32.xlu0 %v1602_v63, %s2644_s11  ;;  %v2475_v34 = vunpack.i.l.bf16 %v3348_v17  ;;  %v2476_v28 = vunpack.i.h.bf16 %v3348_v17 }
 0x28a   : > { %v3351_v31 = vpop.permute.xlu1 %2448 }
 0x28b   : > { %v2484_v15 = vpop.permute.xlu0 %2483  ;;  %v2450_v49 = vunpack.i.l.bf16 %v3351_v31 }
 0x28c   : > { %v2485_v16 = vunpack.i.l.bf16 %v2484_v15  ;;  %v2486_v26 = vunpack.i.h.bf16 %v2484_v15 }
 0x28d   : > { %v1553_v60 = vsel %vm584_vm0, %v2446_v47, %v2450_v49  ;;  %v1396_v47 = vsel %vm424_vm4, %v2475_v34, %v2476_v28 }
 0x28e   : > { %v1592_v56 = vpack.c.bf16 %v2485_v16, %v2475_v34  ;;  %v3354_v11 = vpop.permute.xlu1 %2458  ;;  %v1614_v62 = vpack.c.bf16 %v1553_v60, %v1553_v60  ;;  %v1435_v63 = vsel %vm464_vm3, %v2485_v16, %v2486_v26  ;;  %v2430_v16 = vunpack.i.l.bf16 %v3341_v8 }
 0x28f   : > { %v3356_v2 = vpop.permute.xlu0 %2493  ;;  %v2460_v52 = vunpack.i.l.bf16 %v3354_v11 }
 0x290   : > { %1718 = vrot.lane.b32.xlu1 %v1592_v56, %s2644_s11  ;;  %v2495_v46 = vunpack.i.l.bf16 %v3356_v2  ;;  %v2496_v9 = vunpack.i.h.bf16 %v3356_v2  ;;  %v2435_v56 = vunpack.i.l.bf16 %v3344_v1  ;;  %v2440_v2 = vunpack.i.l.bf16 %v3346_v19 }
 0x291   : > { %v1475_v50 = vsel %vm504_vm2, %v2456_v27, %v2460_v52 }
 0x292   : > { %v3360_v13 = vpop.permute.xlu1 %2468  ;;  %v1314_v51 = vsel %vm340_vm5, %v2431_v59, %v2495_v46  ;;  %v1316_v34 = vsel %vm340_vm5, %v2496_v9, %v2430_v16 }
 0x293   : > { %v2499_v53 = vpop.permute.xlu0 %2498  ;;  %v2470_v22 = vunpack.i.l.bf16 %v3360_v13 }
 0x294   : > { %v2500_v6 = vunpack.i.l.bf16 %v2499_v53  ;;  %v2501_v23 = vunpack.i.h.bf16 %v2499_v53  ;;  %v1315_v53 = vsel %vm340_vm5, %v2495_v46, %v2496_v9 }
 0x295   : > { %v1514_v3 = vsel %vm544_vm1, %v2466_v55, %v2470_v22 }
 0x296   : > { %v1356_v0 = vsel %vm383_vm6, %v2436_v45, %v2500_v6  ;;  %v3366_v10 = vpop.permute.xlu1 %2478  ;;  %v1604_v7 = vpack.c.bf16 %v1514_v3, %v1475_v50  ;;  %v1357_v17 = vsel %vm383_vm6, %v2500_v6, %v2501_v23  ;;  %v1593_v45 = vpack.c.bf16 %v1435_v63, %v1396_v47 }
 0x297   : > { %v1582_v35 = vpack.c.bf16 %v1356_v0, %v1314_v51  ;;  %v2504_v32 = vpop.permute.xlu0 %2503  ;;  %v2480_v57 = vunpack.i.l.bf16 %v3366_v10  ;;  %v1583_v51 = vpack.c.bf16 %v1357_v17, %v1315_v53  ;;  %v2451_v6 = vunpack.i.h.bf16 %v3351_v31 }
 0x298   : > { %v2505_v5 = vunpack.i.l.bf16 %v2504_v32  ;;  %v2506_v15 = vunpack.i.h.bf16 %v2504_v32  ;;  %v1358_v0 = vsel %vm383_vm6, %v2501_v23, %v2435_v56 }
 0x299   : > { %1698 = vrot.lane.b32.xlu0 %v1582_v35, %s2644_s11  ;;  %v1397_v29 = vsel %vm424_vm4, %v2476_v28, %v2480_v57  ;;  %v1584_v35 = vpack.c.bf16 %v1358_v0, %v1316_v34  ;;  %v1554_v31 = vsel %vm584_vm0, %v2450_v49, %v2451_v6 }
 0x29a   : > { %v1275_v30 = vsel %vm300_vm7, %v2441_v25, %v2505_v5  ;;  %v3373_v54 = vpop.permute.xlu1 %2488  ;;  %v1277_v1 = vsel %vm300_vm7, %v2506_v15, %v2440_v2  ;;  %v1276_v32 = vsel %vm300_vm7, %v2505_v5, %v2506_v15  ;;  %v2471_v25 = vunpack.i.h.bf16 %v3360_v13 }
 0x29b   : > { %v1572_v43 = vpack.c.bf16 %v1275_v30, %v2646_v40  ;;  %v2490_v24 = vunpack.i.l.bf16 %v3373_v54  ;;  %v1603_v40 = vpack.c.bf16 %v1513_v48, %v1474_v33  ;;  %v1574_v8 = vpack.c.bf16 %v1277_v1, %v3243_v21 }
 0x29c   : > { %v1615_v30 = vpack.c.bf16 %v1554_v31, %v1554_v31  ;;  %v1515_v5 = vsel %vm544_vm1, %v2470_v22, %v2471_v25  ;;  %v2491_v48 = vunpack.i.h.bf16 %v3373_v54 }
 0x29d   : > { %1678 = vrot.lane.b32.xlu1 %v1572_v43, %s2644_s11  ;;  %1760 = vrot.lane.b32.xlu0 %v1613_v44, %s2644_s11  ;;  %v1436_v18 = vsel %vm464_vm3, %v2486_v26, %v2490_v24  ;;  %v2461_v44 = vunpack.i.h.bf16 %v3354_v11  ;;  %v1573_v43 = vpack.c.bf16 %v1276_v32, %v3239_v4  ;;  %v2481_v4 = vunpack.i.h.bf16 %v3366_v10 }
 0x29e   : > { %v1594_v58 = vpack.c.bf16 %v1436_v18, %v1397_v29  ;;  %v1437_v22 = vsel %vm464_vm3, %v2490_v24, %v2491_v48 }
 0x29f   : > { %v1476_v11 = vsel %vm504_vm2, %v2460_v52, %v2461_v44  ;;  %v1398_v52 = vsel %vm424_vm4, %v2480_v57, %v2481_v4 }
 0x2a0   : > { %v1605_v26 = vpack.c.bf16 %v1515_v5, %v1476_v11  ;;  %v1595_v18 = vpack.c.bf16 %v1437_v22, %v1398_v52 }
 0x2a1   : > { %1762 = vrot.lane.b32.xlu1 %v1614_v62, %s2644_s11  ;;  %1740 = vrot.lane.b32.xlu0 %v1603_v40, %s2644_s11 }
 0x2a2   : > { %v3397_v37 = vpop.permute.xlu0 %2508 }
 0x2a3   : > { %v2510_v23 = vunpack.i.l.bf16 %v3397_v37 }
 0x2a5   : > { %1742 = vrot.lane.b32.xlu1 %v1604_v7, %s2644_s11  ;;  %1722 = vrot.lane.b32.xlu0 %v1594_v58, %s2644_s11  ;;  %v1317_v57 = vsel %vm340_vm5, %v2430_v16, %v2510_v23  ;;  %v2511_v16 = vunpack.i.h.bf16 %v3397_v37 }
 0x2a6   : > { %v3407_v59 = vpop.permute.xlu0 %2513 }
 0x2a7   : > { %v2515_v62 = vunpack.i.l.bf16 %v3407_v59  ;;  %v1318_v32 = vsel %vm340_vm5, %v2510_v23, %v2511_v16 }
 0x2a8   : > { %v3415_v38 = vpop.permute.xlu1 %2528 }
 0x2a9   : > { %1720 = vrot.lane.b32.xlu1 %v1593_v45, %s2644_s11  ;;  %1700 = vrot.lane.b32.xlu0 %v1583_v51, %s2644_s11  ;;  %v1359_v50 = vsel %vm383_vm6, %v2435_v56, %v2515_v62  ;;  %v2516_v45 = vunpack.i.h.bf16 %v3407_v59 }
 0x2aa   : > { %v3420_v46 = vpop.permute.xlu0 %2518  ;;  %v1585_v63 = vpack.c.bf16 %v1359_v50, %v1317_v57 }
 0x2ab   : > { %v2520_v9 = vunpack.i.l.bf16 %v3420_v46  ;;  %v1360_v59 = vsel %vm383_vm6, %v2515_v62, %v2516_v45  ;;  %v2521_v37 = vunpack.i.h.bf16 %v3420_v46 }
 0x2ac   : > { %v3425_v55 = vpop.permute.xlu1 %2538 }
 0x2ad   : > { %1702 = vrot.lane.b32.xlu1 %v1584_v35, %s2644_s11  ;;  %1682 = vrot.lane.b32.xlu0 %v1574_v8, %s2644_s11  ;;  %v1278_v15 = vsel %vm300_vm7, %v2440_v2, %v2520_v9 }
 0x2ae   : > { %v3430_v27 = vpop.permute.xlu0 %2523 }
 0x2af   : > { %v2525_v21 = vunpack.i.l.bf16 %v3430_v27  ;;  %v2526_v56 = vunpack.i.h.bf16 %v3430_v27 }
 0x2b0   : > { %v3435_v49 = vpop.permute.xlu1 %2548 }
 0x2b1   : > { %v1555_v13 = vsel %vm584_vm0, %v2451_v6, %v2525_v21  ;;  %1680 = vrot.lane.b32.xlu1 %v1573_v43, %s2644_s11  ;;  %1764 = vrot.lane.b32.xlu0 %v1615_v30, %s2644_s11  ;;  %v1575_v6 = vpack.c.bf16 %v1278_v15, %v3249_v14  ;;  %v1556_v0 = vsel %vm584_vm0, %v2525_v21, %v2526_v56 }
 0x2b2   : > { %v1616_v60 = vpack.c.bf16 %v1555_v13, %v1555_v13  ;;  %v3442_v33 = vpop.permute.xlu0 %2533  ;;  %v1617_v31 = vpack.c.bf16 %v1556_v0, %v1556_v0  ;;  %v1586_v30 = vpack.c.bf16 %v1360_v59, %v1318_v32  ;;  %v1279_v43 = vsel %vm300_vm7, %v2520_v9, %v2521_v37 }
 0x2b3   : > { %v2535_v28 = vunpack.i.l.bf16 %v3442_v33  ;;  %v2536_v14 = vunpack.i.h.bf16 %v3442_v33  ;;  %v2530_v13 = vunpack.i.l.bf16 %v3415_v38  ;;  %v1576_v11 = vpack.c.bf16 %v1279_v43, %v3252_v39 }
 0x2b4   : > { %v3446_v40 = vpop.permute.xlu1 %2558 }
 0x2b5   : > { %1766 = vrot.lane.b32.xlu1 %v1616_v60, %s2644_s11  ;;  %1744 = vrot.lane.b32.xlu0 %v1605_v26, %s2644_s11  ;;  %v1477_v29 = vsel %vm504_vm2, %v2461_v44, %v2535_v28  ;;  %v1478_v21 = vsel %vm504_vm2, %v2535_v28, %v2536_v14 }
 0x2b6   : > { %v3455_v3 = vpop.permute.xlu0 %2543 }
 0x2b7   : > { %v2545_v54 = vunpack.i.l.bf16 %v3455_v3  ;;  %v2546_v19 = vunpack.i.h.bf16 %v3455_v3  ;;  %v2550_v3 = vunpack.i.l.bf16 %v3435_v49 }
 0x2b8   : > { %v3462_v24 = vpop.permute.xlu1 %2568 }
 0x2b9   : > { %v1516_v7 = vsel %vm544_vm1, %v2471_v25, %v2545_v54  ;;  %1724 = vrot.lane.b32.xlu0 %v1595_v18, %s2644_s11  ;;  %v1517_v25 = vsel %vm544_vm1, %v2545_v54, %v2546_v19  ;;  %v2540_v18 = vunpack.i.l.bf16 %v3425_v55  ;;  %v1518_v50 = vsel %vm544_vm1, %v2546_v19, %v2550_v3 }
 0x2ba   : > { %v1606_v58 = vpack.c.bf16 %v1516_v7, %v1477_v29  ;;  %v3469_v10 = vpop.permute.xlu0 %2553  ;;  %v1607_v5 = vpack.c.bf16 %v1517_v25, %v1478_v21  ;;  %v2531_v7 = vunpack.i.h.bf16 %v3415_v38  ;;  %v2571_v43 = vunpack.i.h.bf16 %v3462_v24 }
 0x2bb   : > { %v2555_v47 = vunpack.i.l.bf16 %v3469_v10  ;;  %v2556_v46 = vunpack.i.h.bf16 %v3469_v10  ;;  %v2570_v10 = vunpack.i.l.bf16 %v3462_v24 }
 0x2bc   : > { %v3472_v17 = vpop.permute.xlu1 %2573  ;;  %1746 = vrot.lane.b32.xlu1 %v1606_v58, %s2644_s11  ;;  %v1479_v58 = vsel %vm504_vm2, %v2536_v14, %v2540_v18 }
 0x2bd   : > { %1704 = vrot.lane.b32.xlu0 %v1585_v63, %s2644_s11  ;;  %v1399_v2 = vsel %vm424_vm4, %v2481_v4, %v2555_v47  ;;  %v1557_v4 = vsel %vm584_vm0, %v2526_v56, %v2530_v13  ;;  %v1400_v26 = vsel %vm424_vm4, %v2555_v47, %v2556_v46  ;;  %v2575_v22 = vunpack.i.l.bf16 %v3472_v17 }
 0x2be   : > { %v2564_v53 = vpop.permute.xlu0 %2563  ;;  %v1618_v39 = vpack.c.bf16 %v1557_v4, %v1557_v4  ;;  %v1608_v63 = vpack.c.bf16 %v1518_v50, %v1479_v58  ;;  %v2560_v56 = vunpack.i.l.bf16 %v3446_v40 }
 0x2bf   : > { %v2565_v51 = vunpack.i.l.bf16 %v2564_v53  ;;  %v2566_v27 = vunpack.i.h.bf16 %v2564_v53  ;;  %v1319_v9 = vsel %vm340_vm5, %v2511_v16, %v2575_v22 }
 0x2c0   : > { %v3488_v35 = vpop.permute.xlu1 %2578  ;;  %v1401_v16 = vsel %vm424_vm4, %v2556_v46, %v2560_v56  ;;  %v2561_v46 = vunpack.i.h.bf16 %v3446_v40 }
 0x2c1   : > { %v1438_v1 = vsel %vm464_vm3, %v2491_v48, %v2565_v51  ;;  %1684 = vrot.lane.b32.xlu0 %v1575_v6, %s2644_s11  ;;  %v1439_v60 = vsel %vm464_vm3, %v2565_v51, %v2566_v27  ;;  %v2580_v33 = vunpack.i.l.bf16 %v3488_v35  ;;  %v1440_v47 = vsel %vm464_vm3, %v2566_v27, %v2570_v10 }
 0x2c2   : > { %v1596_v34 = vpack.c.bf16 %v1438_v1, %v1399_v2  ;;  %v3491_v8 = vpop.permute.xlu0 %2593  ;;  %v1597_v62 = vpack.c.bf16 %v1439_v60, %v1400_v26  ;;  %v2581_v53 = vunpack.i.h.bf16 %v3488_v35  ;;  %v1558_v51 = vsel %vm584_vm0, %v2530_v13, %v2531_v7 }
 0x2c3   : > { %v1361_v52 = vsel %vm383_vm6, %v2516_v45, %v2580_v33  ;;  %v2576_v6 = vunpack.i.h.bf16 %v3472_v17  ;;  %v1598_v19 = vpack.c.bf16 %v1440_v47, %v1401_v16  ;;  %v2551_v2 = vunpack.i.h.bf16 %v3435_v49 }
 0x2c4   : > { %1726 = vrot.lane.b32.xlu1 %v1596_v34, %s2644_s11  ;;  %v3505_v48 = vpop.permute.xlu1 %2583  ;;  %v1587_v29 = vpack.c.bf16 %v1361_v52, %v1319_v9  ;;  %v1619_v59 = vpack.c.bf16 %v1558_v51, %v1558_v51  ;;  %v1402_v40 = vsel %vm424_vm4, %v2560_v56, %v2561_v46 }
 0x2c5   : > { %1768 = vrot.lane.b32.xlu0 %v1617_v31, %s2644_s11  ;;  %v2585_v23 = vunpack.i.l.bf16 %v3505_v48  ;;  %v2586_v1 = vunpack.i.h.bf16 %v3505_v48  ;;  %v1320_v14 = vsel %vm340_vm5, %v2575_v22, %v2576_v6  ;;  %v1519_v48 = vsel %vm544_vm1, %v2550_v3, %v2551_v2 }
 0x2c6   : > { %v3500_v44 = vpop.permute.xlu0 %2598  ;;  %v2596_v22 = vunpack.i.h.bf16 %v3491_v8 }
 0x2c7   : > { %v1280_v57 = vsel %vm300_vm7, %v2521_v37, %v2585_v23  ;;  %v2541_v37 = vunpack.i.h.bf16 %v3425_v55  ;;  %v1281_v27 = vsel %vm300_vm7, %v2585_v23, %v2586_v1 }
 0x2c8   : > { %1706 = vrot.lane.b32.xlu1 %v1586_v30, %s2644_s11  ;;  %v3522_v54 = vpop.permute.xlu1 %2588  ;;  %v1577_v45 = vpack.c.bf16 %v1280_v57, %v3281_v61  ;;  %v1362_v61 = vsel %vm383_vm6, %v2580_v33, %v2581_v53 }
 0x2c9   : > { %1748 = vrot.lane.b32.xlu0 %v1607_v5, %s2644_s11  ;;  %v1588_v25 = vpack.c.bf16 %v1362_v61, %v1320_v14  ;;  %v1578_v5 = vpack.c.bf16 %v1281_v27, %v3286_v12  ;;  %v1480_v33 = vsel %vm504_vm2, %v2540_v18, %v2541_v37  ;;  %v2591_v24 = vunpack.i.h.bf16 %v3522_v54 }
 0x2ca   : > { %v3516_v28 = vpop.permute.xlu0 %2603  ;;  %v2590_v4 = vunpack.i.l.bf16 %v3522_v54  ;;  %v1609_v26 = vpack.c.bf16 %v1519_v48, %v1480_v33 }
 0x2cb   : > { %v2606_v31 = vunpack.i.h.bf16 %v3516_v28  ;;  %v2605_v49 = vunpack.i.l.bf16 %v3516_v28 }
 0x2cc   : > { %1686 = vrot.lane.b32.xlu1 %v1576_v11, %s2644_s11  ;;  %v3540_v38 = vpop.permute.xlu1 %2608  ;;  %v1441_v11 = vsel %vm464_vm3, %v2570_v10, %v2571_v43  ;;  %v1322_v23 = vsel %vm340_vm5, %v2590_v4, %v2591_v24 }
 0x2cd   : > { %1728 = vrot.lane.b32.xlu0 %v1597_v62, %s2644_s11  ;;  %v2610_v34 = vunpack.i.l.bf16 %v3540_v38  ;;  %v1560_v21 = vsel %vm584_vm0, %v2605_v49, %v2606_v31  ;;  %v2595_v62 = vunpack.i.l.bf16 %v3491_v8  ;;  %v1559_v28 = vsel %vm584_vm0, %v2531_v7, %v2605_v49 }
 0x2ce   : > { %v3533_v15 = vpop.permute.xlu0 %2613  ;;  %v1621_v13 = vpack.c.bf16 %v1560_v21, %v1560_v21  ;;  %v1599_v52 = vpack.c.bf16 %v1441_v11, %v1402_v40  ;;  %v1620_v18 = vpack.c.bf16 %v1559_v28, %v1559_v28  ;;  %v2600_v7 = vunpack.i.l.bf16 %v3500_v44  ;;  %v3637_v28 = vld [vmem:[%s3718_s4] sm:$0xf] }
 0x2cf   : > { %v2615_v0 = vunpack.i.l.bf16 %v3533_v15  ;;  %v1481_v30 = vsel %vm504_vm2, %v2541_v37, %v2610_v34  ;;  %v1364_v50 = vsel %vm383_vm6, %v2595_v62, %v2596_v22  ;;  %v2616_v9 = vunpack.i.h.bf16 %v3533_v15 }
 0x2d0   : > { %1770 = vrot.lane.b32.xlu1 %v1618_v39, %s2644_s11  ;;  %v2619_v12 = vpop.permute.xlu1 %2618  ;;  %v1590_v58 = vpack.c.bf16 %v1364_v50, %v1322_v23  ;;  %v2611_v10 = vunpack.i.h.bf16 %v3540_v38  ;;  %v1282_v51 = vsel %vm300_vm7, %v2586_v1, %v2600_v7  ;;  %v1321_v38 = vsel %vm340_vm5, %v2576_v6, %v2590_v4 }
 0x2d1   : > { %1708 = vrot.lane.b32.xlu0 %v1587_v29, %s2644_s11  ;;  %v1520_v32 = vsel %vm544_vm1, %v2551_v2, %v2615_v0  ;;  %v2620_v39 = vunpack.i.l.bf16 %v2619_v12  ;;  %v2621_v29 = vunpack.i.h.bf16 %v2619_v12  ;;  %v1521_v47 = vsel %vm544_vm1, %v2615_v0, %v2616_v9 }
 0x2d2   : > { %v1610_v55 = vpack.c.bf16 %v1520_v32, %v1481_v30  ;;  %v2624_v60 = vpop.permute.xlu0 %2623  ;;  %v1482_v16 = vsel %vm504_vm2, %v2610_v34, %v2611_v10  ;;  %v2601_v2 = vunpack.i.h.bf16 %v3500_v44  ;;  %v1579_v0 = vpack.c.bf16 %v1282_v51, %v3291_v41  ;;  %v1622_v44 = vld [vmem:[%s3719_s5] sm:$0xff] }
 0x2d3   : > { %v2625_v3 = vunpack.i.l.bf16 %v2624_v60  ;;  %v2626_v54 = vunpack.i.h.bf16 %v2624_v60  ;;  %v1403_v57 = vsel %vm424_vm4, %v2561_v46, %v2620_v39  ;;  %v1404_v15 = vsel %vm424_vm4, %v2620_v39, %v2621_v29 }
 0x2d4   : > { %1750 = vrot.lane.b32.xlu1 %v1608_v63, %s2644_s11  ;;  %v1355_v61 = vpop.permute.xlu1 %1354  ;;  %v1363_v1 = vsel %vm383_vm6, %v2581_v53, %v2595_v62  ;;  %v1581_v17 = vpack.c.bf16 %v2601_v2, %v3315_v36  ;;  %v1283_v41 = vsel %vm300_vm7, %v2600_v7, %v2601_v2 }
 0x2d5   : > { %1688 = vrot.lane.b32.xlu0 %v1577_v45, %s2644_s11  ;;  %v1442_v8 = vsel %vm464_vm3, %v2571_v43, %v2625_v3  ;;  %v1443_v63 = vsel %vm464_vm3, %v2625_v3, %v2626_v54  ;;  %v1365_v34 = vsel %vm383_vm6, %v2596_v22, %v1355_v61  ;;  %v1580_v35 = vpack.c.bf16 %v1283_v41, %v3294_v20 }
 0x2d6   : > { %v1600_v56 = vpack.c.bf16 %v1442_v8, %v1403_v57  ;;  %v1601_v45 = vpack.c.bf16 %v1443_v63, %v1404_v15  ;;  %v1591_v6 = vpack.c.bf16 %v1365_v34, %v2591_v24 }
 0x2d8   : > { %1730 = vrot.lane.b32.xlu1 %v1598_v19, %s2644_s11  ;;  %v1611_v19 = vpack.c.bf16 %v1521_v47, %v1482_v16 }
 0x2d9   : > { %1772 = vrot.lane.b32.xlu0 %v1619_v59, %s2644_s11  ;;  %v1589_v59 = vpack.c.bf16 %v1363_v1, %v1321_v38 }
 0x2dc   : > { %1710 = vrot.lane.b32.xlu1 %v1588_v25, %s2644_s11 }
 0x2dd   : > { %1754 = vrot.lane.b32.xlu0 %v1610_v55, %s2644_s11 }
 0x2e0   : > { %1690 = vrot.lane.b32.xlu1 %v1578_v5, %s2644_s11 }
 0x2e1   : > { %1776 = vrot.lane.b32.xlu0 %v1621_v13, %s2644_s11 }
 0x2e4   : > { %1752 = vrot.lane.b32.xlu1 %v1609_v26, %s2644_s11 }
 0x2e5   : > { %1732 = vrot.lane.b32.xlu0 %v1599_v52, %s2644_s11 }
 0x2e8   : > { %1774 = vrot.lane.b32.xlu1 %v1620_v18, %s2644_s11 }
 0x2e9   : > { %1714 = vrot.lane.b32.xlu0 %v1590_v58, %s2644_s11 }
 0x2ec   : > { %1734 = vrot.lane.b32.xlu1 %v1600_v56, %s2644_s11 }
 0x2ed   : > { %1736 = vrot.lane.b32.xlu0 %v1601_v45, %s2644_s11 }
 0x2f0   : > { %1756 = vrot.lane.b32.xlu1 %v1611_v19, %s2644_s11 }
 0x2f1   : > { %1692 = vrot.lane.b32.xlu0 %v1579_v0, %s2644_s11 }
 0x2f2   : > { %v1759_v53 = vpop.permute.xlu1 %1758 }
 0x2f4   : > { %1712 = vrot.lane.b32.xlu1 %v1589_v59, %s2644_s11 }
 0x2f5   : > { %1696 = vrot.lane.b32.xlu0 %v1581_v17, %s2644_s11 }
 0x2f8   : > { %1716 = vrot.lane.b32.xlu1 %v1591_v6, %s2644_s11 }
 0x2fa   : > { %v1739_v36 = vpop.permute.xlu0 %1738 }
 0x2fc   : > { %1694 = vrot.lane.b32.xlu1 %v1580_v35, %s2644_s11 }
 0x300   : > { %1625 = vperm.xlu1 %2426, %v1622_v44  }
 0x302   : > { %v1719_v37 = vpop.permute.xlu1 %1718 }
 0x30b   : > { %v1699_v14 = vpop.permute.xlu0 %1698 }
 0x30f   : > { %v1679_v31 = vpop.permute.xlu1 %1678  ;;  %v1761_v49 = vpop.permute.xlu0 %1760 }
 0x310   : > { %v1814_v32 = vsel %vm811_vm8, %v1759_v53, %v1761_v49 }
 0x311   : > { %v1867_v20 = vsel %vm901_vm9, %v1814_v32, 0 }
 0x313   : > { %v1763_v25 = vpop.permute.xlu1 %1762  ;;  %v1741_v27 = vpop.permute.xlu0 %1740 }
 0x314   : > { %v1815_v30 = vsel %vm811_vm8, %v1761_v49, %v1763_v25  ;;  %v1805_v46 = vsel %vm811_vm8, %v1739_v36, %v1741_v27 }
 0x315   : > { %2193 = vmatprep.subr.msk.bf16.mxu1 %vm901_vm9, %v1815_v30 }
 0x316   : > { %1903 = vmatpush1.bf16.msra.mxu1 %v1867_v20 }
 0x317   : > { %v1743_v55 = vpop.permute.xlu1 %1742  ;;  %v1723_v43 = vpop.permute.xlu0 %1722 }
 0x318   : > { %v1806_v21 = vsel %vm811_vm8, %v1741_v27, %v1743_v55 }
 0x319   : > { %1904 = vmatprep.subr.bf16.mxu1 %v1806_v21 }
 0x31a   : > { %1905 = vmatpush1.bf16.msra.mxu1 %v1805_v46 }
 0x31b   : > { %v1721_v5 = vpop.permute.xlu1 %1720  ;;  %v1701_v48 = vpop.permute.xlu0 %1700 }
 0x31c   : > { %v1796_v13 = vsel %vm811_vm8, %v1719_v37, %v1721_v5  ;;  %v1797_v60 = vsel %vm811_vm8, %v1721_v5, %v1723_v43  ;;  %v1787_v4 = vsel %vm811_vm8, %v1699_v14, %v1701_v48 }
 0x31d   : > { %1906 = vmatprep.subr.bf16.mxu1 %v1797_v60 }
 0x31e   : > { %1907 = vmatpush1.bf16.msra.mxu1 %v1796_v13 }
 0x31f   : > { %v1703_v33 = vpop.permute.xlu1 %1702  ;;  %v1683_v11 = vpop.permute.xlu0 %1682 }
 0x320   : > { %v1788_v24 = vsel %vm811_vm8, %v1701_v48, %v1703_v33 }
 0x321   : > { %1908 = vmatprep.subr.bf16.mxu1 %v1788_v24 }
 0x322   : > { %1909 = vmatpush1.bf16.msra.mxu1 %v1787_v4 }
 0x323   : > { %v1681_v26 = vpop.permute.xlu1 %1680  ;;  %v1765_v40 = vpop.permute.xlu0 %1764 }
 0x324   : > { %v1778_v12 = vsel %vm811_vm8, %v1679_v31, %v1681_v26  ;;  %v1779_v22 = vsel %vm811_vm8, %v1681_v26, %v1683_v11  ;;  %v1816_v62 = vsel %vm811_vm8, %v1763_v25, %v1765_v40 }
 0x325   : > { %1910 = vmatprep.subr.bf16.mxu1 %v1779_v22  ;;  %v1873_v39 = vsel %vm901_vm9, %v1816_v62, 0 }
 0x326   : > { %1911 = vmatpush1.bf16.msra.mxu1 %v1778_v12 }
 0x327   : > { %v1767_v3 = vpop.permute.xlu1 %1766  ;;  %v1745_v23 = vpop.permute.xlu0 %1744 }
 0x328   : > { %v1817_v52 = vsel %vm811_vm8, %v1765_v40, %v1767_v3  ;;  %v1807_v9 = vsel %vm811_vm8, %v1743_v55, %v1745_v23 }
 0x329   : > { %2194 = vmatmul.mubr.msk.bf16.vlgmr.msra.gmra.mxu1 %vm897_vm10, %v3637_v28  ;;  %2195 = vmatprep.subr.msk.bf16.mxu0 %vm901_vm9, %v1817_v52 }
 0x32a   : > { %1944 = vmatpush1.bf16.msra.mxu0 %v1873_v39  ;;  %2010 = vmatprep.mubr.bf16.mxu1 %v2645_v42 }
 0x32b   : > { %v1725_v54 = vpop.permute.xlu0 %1724 }
 0x32c   : > { %v1798_v10 = vsel %vm811_vm8, %v1723_v43, %v1725_v54 }
 0x32e   : > { %v1747_v18 = vpop.permute.xlu1 %1746 }
 0x32f   : > { %v1808_v50 = vsel %vm811_vm8, %v1745_v23, %v1747_v18  ;;  %v1705_v29 = vpop.permute.xlu0 %1704 }
 0x330   : > { %1945 = vmatprep.subr.bf16.mxu0 %v1808_v50  ;;  %v1789_v47 = vsel %vm811_vm8, %v1703_v33, %v1705_v29 }
 0x331   : > { %1946 = vmatpush1.bf16.msra.mxu0 %v1807_v9 }
 0x333   : > { %v1685_v8 = vpop.permute.xlu0 %1684 }
 0x334   : > { %v1780_v16 = vsel %vm811_vm8, %v1683_v11, %v1685_v8 }
 0x336   : > { %v1727_v58 = vpop.permute.xlu1 %1726 }
 0x337   : > { %v1799_v7 = vsel %vm811_vm8, %v1725_v54, %v1727_v58  ;;  %v1769_v57 = vpop.permute.xlu0 %1768 }
 0x338   : > { %1947 = vmatprep.subr.bf16.mxu0 %v1799_v7  ;;  %v1818_v38 = vsel %vm811_vm8, %v1767_v3, %v1769_v57 }
 0x339   : > { %1948 = vmatpush1.bf16.msra.mxu0 %v1798_v10  ;;  %v1879_v61 = vsel %vm901_vm9, %v1818_v38, 0 }
 0x33a   : > { %v1707_v63 = vpop.permute.xlu1 %1706 }
 0x33b   : > { %v1790_v56 = vsel %vm811_vm8, %v1705_v29, %v1707_v63  ;;  %v1749_v15 = vpop.permute.xlu0 %1748 }
 0x33c   : > { %1949 = vmatprep.subr.bf16.mxu0 %v1790_v56  ;;  %v1809_v17 = vsel %vm811_vm8, %v1747_v18, %v1749_v15 }
 0x33d   : > { %1950 = vmatpush1.bf16.msra.mxu0 %v1789_v47 }
 0x33e   : > { %v1687_v45 = vpop.permute.xlu1 %1686 }
 0x33f   : > { %v1781_v51 = vsel %vm811_vm8, %v1685_v8, %v1687_v45  ;;  %v1729_v19 = vpop.permute.xlu0 %1728 }
 0x340   : > { %1951 = vmatprep.subr.bf16.mxu0 %v1781_v51  ;;  %v1800_v44 = vsel %vm811_vm8, %v1727_v58, %v1729_v19 }
 0x341   : > { %1952 = vmatpush1.bf16.msra.mxu0 %v1780_v16 }
 0x342   : > { %v1771_v2 = vpop.permute.xlu1 %1770 }
 0x343   : > { %v1819_v0 = vsel %vm811_vm8, %v1769_v57, %v1771_v2  ;;  %v1709_v1 = vpop.permute.xlu0 %1708 }
 0x344   : > { %2196 = vmatmul.mubr.msk.bf16.vlgmr.msra.gmra.mxu0 %vm897_vm10, %v3637_v28  ;;  %2197 = vmatprep.subr.msk.bf16.mxu1 %vm901_vm9, %v1819_v0  ;;  %v1791_v14 = vsel %vm811_vm8, %v1707_v63, %v1709_v1 }
 0x345   : > { %1985 = vmatpush1.bf16.msra.mxu1 %v1879_v61  ;;  %2051 = vmatprep.mubr.bf16.mxu0 %v2645_v42 }
 0x346   : > { %v1751_v59 = vpop.permute.xlu1 %1750 }
 0x347   : > { %v1810_v34 = vsel %vm811_vm8, %v1749_v15, %v1751_v59  ;;  %v1689_v6 = vpop.permute.xlu0 %1688 }
 0x348   : > { %1986 = vmatprep.subr.bf16.mxu1 %v1810_v34  ;;  %v1782_v25 = vsel %vm811_vm8, %v1687_v45, %v1689_v6 }
 0x349   : > { %1987 = vmatpush1.bf16.msra.mxu1 %v1809_v17 }
 0x34a   : > { %v1731_v41 = vpop.permute.xlu1 %1730 }
 0x34b   : > { %v1801_v35 = vsel %vm811_vm8, %v1729_v19, %v1731_v41  ;;  %v1773_v53 = vpop.permute.xlu0 %1772 }
 0x34c   : > { %1988 = vmatprep.subr.bf16.mxu1 %v1801_v35  ;;  %v1820_v55 = vsel %vm811_vm8, %v1771_v2, %v1773_v53 }
 0x34d   : > { %1989 = vmatpush1.bf16.msra.mxu1 %v1800_v44  ;;  %v1885_v5 = vsel %vm901_vm9, %v1820_v55, 0 }
 0x34e   : > { %v1711_v36 = vpop.permute.xlu1 %1710 }
 0x34f   : > { %v1792_v37 = vsel %vm811_vm8, %v1709_v1, %v1711_v36  ;;  %v1755_v31 = vpop.permute.xlu0 %1754 }
 0x350   : > { %1990 = vmatprep.subr.bf16.mxu1 %v1792_v37 }
 0x351   : > { %1991 = vmatpush1.bf16.msra.mxu1 %v1791_v14 }
 0x352   : > { %v1691_v49 = vpop.permute.xlu1 %1690 }
 0x353   : > { %v1783_v32 = vsel %vm811_vm8, %v1689_v6, %v1691_v49  ;;  %v1777_v27 = vpop.permute.xlu0 %1776 }
 0x354   : > { %1992 = vmatprep.subr.bf16.mxu1 %v1783_v32 }
 0x355   : > { %1993 = vmatpush1.bf16.msra.mxu1 %v1782_v25 }
 0x356   : > { %v1753_v30 = vpop.permute.xlu1 %1752  ;;  %2201 = vmatprep.subr.msk.bf16.mxu1 %vm901_vm9, %v1777_v27 }
 0x357   : > { %v1733_v20 = vpop.permute.xlu0 %1732  ;;  %v1812_v60 = vsel %vm811_vm8, %v1753_v30, %v1755_v31 }
 0x358   : > { %2198 = vmatmul.mubr.msk.bf16.vlgmr.msra.gmra.mxu1 %vm897_vm10, %v3637_v28  ;;  %v1802_v40 = vsel %vm811_vm8, %v1731_v41, %v1733_v20 }
 0x359   : > { %2092 = vmatprep.mubr.bf16.mxu1 %v2645_v42  ;;  %v1811_v42 = vsel %vm811_vm8, %v1751_v59, %v1753_v30 }
 0x35a   : > { %v1775_v43 = vpop.permute.xlu1 %1774 }
 0x35b   : > { %v1821_v21 = vsel %vm811_vm8, %v1773_v53, %v1775_v43  ;;  %v1822_v46 = vsel %vm811_vm8, %v1775_v43, %v1777_v27  ;;  %v1715_v13 = vpop.permute.xlu0 %1714 }
 0x35c   : > { %v1891_v48 = vsel %vm901_vm9, %v1822_v46, 0  ;;  %2199 = vmatprep.subr.msk.bf16.mxu0 %vm901_vm9, %v1821_v21 }
 0x35d   : > { %2026 = vmatpush1.bf16.msra.mxu0 %v1885_v5  ;;  %2067 = vmatpush1.bf16.msra.mxu1 %v1891_v48 }
 0x35e   : > { %v1735_v33 = vpop.permute.xlu1 %1734  ;;  %2027 = vmatprep.subr.bf16.mxu0 %v1812_v60 }
 0x35f   : > { %v1737_v11 = vpop.permute.xlu0 %1736  ;;  %v1803_v24 = vsel %vm811_vm8, %v1733_v20, %v1735_v33 }
 0x360   : > { %v1804_v62 = vsel %vm811_vm8, %v1735_v33, %v1737_v11 }
 0x361   : > { %2028 = vmatpush1.bf16.msra.mxu0 %v1811_v42 }
 0x362   : > { %v1757_v4 = vpop.permute.xlu1 %1756  ;;  %2029 = vmatprep.subr.bf16.mxu0 %v1803_v24 }
 0x363   : > { %v1813_v26 = vsel %vm811_vm8, %v1755_v31, %v1757_v4  ;;  %2068 = vmatprep.subr.bf16.mxu1 %v1757_v4  ;;  %v1693_v12 = vpop.permute.xlu0 %1692 }
 0x364   : > { %2069 = vmatpush1.bf16.msra.mxu1 %v1813_v26  ;;  %v1784_v29 = vsel %vm811_vm8, %v1691_v49, %v1693_v12 }
 0x365   : > { %2030 = vmatpush1.bf16.msra.mxu0 %v1802_v40  ;;  %2070 = vmatprep.subr.bf16.mxu1 %v1737_v11 }
 0x366   : > { %v1713_v22 = vpop.permute.xlu1 %1712 }
 0x367   : > { %v1793_v3 = vsel %vm811_vm8, %v1711_v36, %v1713_v22  ;;  %v1794_v52 = vsel %vm811_vm8, %v1713_v22, %v1715_v13  ;;  %v1697_v54 = vpop.permute.xlu0 %1696 }
 0x368   : > { %2031 = vmatprep.subr.bf16.mxu0 %v1794_v52  ;;  %2071 = vmatpush1.bf16.msra.mxu1 %v1804_v62 }
 0x369   : > { %2032 = vmatpush1.bf16.msra.mxu0 %v1793_v3 }
 0x36a   : > { %v1717_v23 = vpop.permute.xlu1 %1716 }
 0x36b   : > { %v1795_v39 = vsel %vm811_vm8, %v1715_v13, %v1717_v23  ;;  %2072 = vmatprep.subr.bf16.mxu1 %v1717_v23 }
 0x36c   : > { %2073 = vmatpush1.bf16.msra.mxu1 %v1795_v39 }
 0x36d   : > { %2074 = vmatprep.subr.bf16.mxu1 %v1697_v54 }
 0x36e   : > { %v1695_v18 = vpop.permute.xlu1 %1694 }
 0x36f   : > { %v1786_v50 = vsel %vm811_vm8, %v1695_v18, %v1697_v54  ;;  %v1785_v9 = vsel %vm811_vm8, %v1693_v12, %v1695_v18 }
 0x370   : > { %2033 = vmatprep.subr.bf16.mxu0 %v1785_v9  ;;  %2075 = vmatpush1.bf16.msra.mxu1 %v1786_v50 }
 0x371   : > { %2034 = vmatpush1.bf16.msra.mxu0 %v1784_v29 }
 0x373   : > { %2202 = vmatmul.mubr.msk.bf16.vlgmr.msra.gmra.mxu1 %vm897_vm10, %v3637_v28 }
 0x374   : > { %2200 = vmatmul.mubr.msk.bf16.vlgmr.msra.gmra.mxu0 %vm897_vm10, %v3637_v28 }
 0x37b   : > { %v1626_v8 = vpop.permute.xlu1 %1625 }
 0x3e9   : > { %v1930_v58 = vpop.f32.mrf.mxu1 }
 0x3ea   : > { %v1931_v7 = vadd.f32 %v1930_v58, %v1626_v8 }
 0x3eb   : > { %v1932_v10 = vpop.f32.mrf.mxu1 }
 0x3ec   : > { %v2101_v57 = vmax.f32 %v1931_v7, 0.0  ;;  %v1933_v63 = vadd.f32 %v1932_v10, %v1626_v8 }
 0x3ed   : > { %v1934_v56 = vpop.f32.mrf.mxu1 }
 0x3ee   : > { %2111 = vst [vmem:[%s3698_s29] sm:$0xff] %v2101_v57  ;;  %v2102_v47 = vmax.f32 %v1933_v63, 0.0 }
 0x3ef   : > { %v1935_v28 = vpop.f32.mrf.mxu1 }
 0x3f0   : > { %2112 = vst [vmem:[%s3698_s29 + $0x8] sm:$0xff] %v2102_v47 }
 0x404   : > { %v1971_v15 = vpop.f32.mrf.mxu0 }
 0x405   : > { %v1972_v45 = vadd.f32 %v1971_v15, %v1626_v8 }
 0x406   : > { %v1973_v51 = vpop.f32.mrf.mxu0 }
 0x407   : > { %v2103_v16 = vmax.f32 %v1972_v45, 0.0  ;;  %v1974_v19 = vadd.f32 %v1973_v51, %v1626_v8 }
 0x408   : > { %v1975_v38 = vpop.f32.mrf.mxu0 }
 0x409   : > { %2113 = vst [vmem:[%s3698_s29 + $0x10] sm:$0xff] %v2103_v16  ;;  %v2104_v2 = vmax.f32 %v1974_v19, 0.0 }
 0x40a   : > { %v1976_v0 = vpop.f32.mrf.mxu0 }
 0x40b   : > { %2114 = vst [vmem:[%s3698_s29 + $0x18] sm:$0xff] %v2104_v2 }
 0x418   : > { %v2012_v61 = vpop.f32.mrf.mxu1 }
 0x419   : > { %v2013_v1 = vadd.f32 %v2012_v61, %v1626_v8 }
 0x41a   : > { %v2014_v59 = vpop.f32.mrf.mxu1 }
 0x41b   : > { %v2105_v34 = vmax.f32 %v2013_v1, 0.0  ;;  %v2015_v17 = vadd.f32 %v2014_v59, %v1626_v8 }
 0x41c   : > { %v2016_v6 = vpop.f32.mrf.mxu1 }
 0x41d   : > { %2115 = vst [vmem:[%s3698_s29 + $0x20] sm:$0xff] %v2105_v34  ;;  %v2106_v41 = vmax.f32 %v2015_v17, 0.0 }
 0x41e   : > { %v2017_v35 = vpop.f32.mrf.mxu1 }
 0x41f   : > { %2116 = vst [vmem:[%s3698_s29 + $0x28] sm:$0xff] %v2106_v41 }
 0x433   : > { %v2094_v44 = vpop.f32.mrf.mxu1 }
 0x434   : > { %v2095_v53 = vadd.f32 %v2094_v44, %v1626_v8  ;;  %v2053_v36 = vpop.f32.mrf.mxu0 }
 0x435   : > { %v2054_v37 = vadd.f32 %v2053_v36, %v1626_v8  ;;  %v2096_v14 = vpop.f32.mrf.mxu1 }
 0x436   : > { %v2109_v31 = vmax.f32 %v2095_v53, 0.0  ;;  %v2097_v49 = vadd.f32 %v2096_v14, %v1626_v8  ;;  %v2055_v32 = vpop.f32.mrf.mxu0 }
 0x437   : > { %v2107_v25 = vmax.f32 %v2054_v37, 0.0  ;;  %v2056_v27 = vadd.f32 %v2055_v32, %v1626_v8  ;;  %v2098_v30 = vpop.f32.mrf.mxu1 }
 0x438   : > { %2119 = vst [vmem:[%s3698_s29 + $0x40] sm:$0xff] %v2109_v31  ;;  %v2110_v20 = vmax.f32 %v2097_v49, 0.0  ;;  %v2057_v55 = vpop.f32.mrf.mxu0 }
 0x439   : > { %2117 = vst [vmem:[%s3698_s29 + $0x30] sm:$0xff] %v2107_v25  ;;  %v2108_v43 = vmax.f32 %v2056_v27, 0.0  ;;  %v2099_v21 = vpop.f32.mrf.mxu1 }
 0x43a   : > { %2120 = vst.msk [vmem:[%s3698_s29 + $0x48] sm:$0xff] %vm1222_vm11, %v2110_v20  ;;  %v2058_v46 = vpop.f32.mrf.mxu0 }
 0x43b   : > { %2118 = vst [vmem:[%s3698_s29 + $0x38] sm:$0xff] %v2108_v43 }
 0x43c PF: > { %s16_s21 = sadd.s32 1, %s2634_s21  }
 0x43d   : > { %p13_p4 = scmp.ge.s32.totalorder %s16_s21, 4  }
 0x43f   :  { %15 = sbr.rel (!%p13_p4) target bundleno = 1 (0x1), region = 74 }

</bundles_post_ra>
